<compile_context>
chip_gen: v5e
topology: v5e:2x2
jax: 0.10.0
libtpu: 0.0.40
codegen_flags: <defaults>
</compile_context>

<pallas_src>
import functools

import jax
import jax.numpy as jnp
from jax.experimental import pallas as pl
from jax.experimental.pallas import tpu as pltpu


def _proj_ln_kernel(x_ref, w_ref, g_ref, b_ref, o_ref, *, eps):
    # x_ref: (tm, K)  flattened patches, bf16 (K = C * p * p)
    # w_ref: (K, E)   projection weight (transposed conv weight), bf16
    # g_ref: (1, E)   LayerNorm gamma, f32
    # b_ref: (1, E)   LayerNorm beta,  f32
    # o_ref: (tm, E)  output rows
    y = jnp.dot(x_ref[...], w_ref[...], preferred_element_type=jnp.float32)  # MXU, f32 acc
    # One-pass LayerNorm statistics (biased variance, like PyTorch LN), all f32.
    mean = jnp.mean(y, axis=-1, keepdims=True)
    msq = jnp.mean(y * y, axis=-1, keepdims=True)
    var = jnp.maximum(msq - mean * mean, 0.0)
    inv = jax.lax.rsqrt(var + eps)                                            # EUP
    o_ref[...] = ((y - mean) * inv * g_ref[...] + b_ref[...]).astype(o_ref.dtype)


def _vmem_capacity_bytes():
    try:
        return int(pltpu.get_tpu_info().vmem_capacity_bytes)
    except Exception:
        return 64 * 1024 * 1024  # conservative fallback (v7x-sized)


def patch_embed(x, proj_w, gamma, beta, *, stride=None, eps=1e-5, tm=2048):
    """PatchEmbed forward.

    x:          (B, C, H, W)
    proj_w:     (E, C, p, p)   conv weight (no bias)
    gamma/beta: (E,)           LayerNorm affine params
    Returns (out, H_new, W_new) with out of shape (B, H_new*W_new, E), dtype of x.
    """
    B, C, H, W = x.shape
    E, _, p, pw = proj_w.shape
    assert p == pw
    if stride is None:
        stride = p
    assert stride == p and H % p == 0 and W % p == 0
    Hn, Wn = H // p, W // p
    K = C * p * p
    M = B * Hn * Wn
    out_dtype = x.dtype
    out_bytes = jnp.dtype(out_dtype).itemsize

    # Space-to-depth fused with the bf16 downcast: ONE XLA pass producing a lane-dense (M, K)
    # bf16 slab (no pad, no extra f32 copy).  Flatten order (c, kh, kw) matches proj_w.reshape.
    xp = (x.reshape(B, C, Hn, p, Wn, p)
            .transpose(0, 2, 4, 1, 3, 5)
            .reshape(M, K)
            .astype(jnp.bfloat16))
    wk = proj_w.reshape(E, K).T.astype(jnp.bfloat16)   # (K, E) bf16, resident on-chip
    g2 = gamma.reshape(1, E).astype(jnp.float32)       # LN params stay f32 (v5e-safe epilogue)
    b2 = beta.reshape(1, E).astype(jnp.float32)

    # --- VMEM budget -> row-tile size ---------------------------------------------------------
    vmem_cap = _vmem_capacity_bytes()
    vmem_limit = max(32 * 1024 * 1024, min(int(vmem_cap * 0.75), 96 * 1024 * 1024))
    # Per row: double-buffered bf16 input, double-buffered output, + f32 intermediate headroom.
    per_row = 2 * K * 2 + 2 * E * out_bytes + 2 * E * 4
    # Fixed: weight (assume worst-case double-buffered), gamma/beta, slack.
    fixed = 2 * K * E * 2 + 4 * E * 4 + (1 << 20)
    tm_budget = max(8, int((0.8 * vmem_limit - fixed) // per_row))
    tm = min(tm, tm_budget)
    # Keep >=2 grid steps whenever M allows, so v7x's two TensorCores both get work.
    tm = min(tm, max(8, -(-(-(-M // 2)) // 8) * 8))   # round_up(cdiv(M, 2), 8)
    tm = max(8, (tm // 8) * 8)
    num_tiles = pl.cdiv(M, tm)

    cost = pl.CostEstimate(
        flops=2 * M * K * E + 10 * M * E,
        transcendentals=M,
        bytes_accessed=2 * M * K + 2 * K * E + 2 * 4 * E + out_bytes * M * E,
    )

    def _make_call(single_buffer_consts):
        if single_buffer_consts:
            def const_spec(shape):
                return pl.BlockSpec(shape, lambda i: (0,) * len(shape),
                                    pipeline_mode=pl.Buffered(1))
        else:
            def const_spec(shape):
                return pl.BlockSpec(shape, lambda i: (0,) * len(shape))
        return pl.pallas_call(
            functools.partial(_proj_ln_kernel, eps=eps),
            out_shape=jax.ShapeDtypeStruct((M, E), out_dtype),
            grid_spec=pltpu.PrefetchScalarGridSpec(
                num_scalar_prefetch=0,
                grid=(num_tiles,),
                in_specs=[
                    pl.BlockSpec((tm, K), lambda i: (i, 0)),   # patch rows (partial tail masked)
                    const_spec((K, E)),                        # projection weight (resident)
                    const_spec((1, E)),                        # gamma
                    const_spec((1, E)),                        # beta
                ],
                out_specs=pl.BlockSpec((tm, E), lambda i: (i, 0)),
            ),
            compiler_params=pltpu.CompilerParams(
                dimension_semantics=("parallel",),
                vmem_limit_bytes=vmem_limit,
            ),
            cost_estimate=cost,
        )

    try:
        out = _make_call(True)(xp, wk, g2, b2)
    except Exception:
        # Fallback if this JAX build rejects pipeline_mode=pl.Buffered(1) on constant operands.
        out = _make_call(False)(xp, wk, g2, b2)

    # Tail rows of a partial final block are undefined -> drop them before reshaping.
    out = out[:M].reshape(B, Hn * Wn, E)
    return out, Hn, Wn


def _ref_forward(x, proj_w, gamma, beta, *, stride, eps=1e-5):
    """Pure-JAX reference mirroring the PyTorch module."""
    y = jax.lax.conv_general_dilated(
        x, proj_w, window_strides=(stride, stride), padding="VALID",
        dimension_numbers=("NCHW", "OIHW", "NCHW"),
        precision=jax.lax.Precision.HIGHEST)
    B, E, Hn, Wn = y.shape
    y = y.reshape(B, E, Hn * Wn).transpose(0, 2, 1)          # (B, N, E)
    mean = jnp.mean(y, axis=-1, keepdims=True)
    var = jnp.var(y, axis=-1, keepdims=True)
    y = (y - mean) * jax.lax.rsqrt(var + eps)
    y = y * gamma + beta
    return y, Hn, Wn


if __name__ == "__main__":
    # Small shapes consistent with the module (patch_size = stride = 1, lane-dense embed dim).
    # H = W = 10 makes M = 200, which does NOT divide the row tile -> exercises the masked
    # partial final block (no jnp.pad path).
    B, Cin, E, Hs, Ws, P = 2, 64, 128, 10, 10, 1

    key = jax.random.PRNGKey(0)
    kx, kw, kg, kb = jax.random.split(key, 4)
    # Round inputs/weights to bf16-representable values so the comparison is insensitive to the
    # bf16 MXU operand dtype (only f32 accumulation order can differ vs the reference).
    x = jax.random.normal(kx, (B, Cin, Hs, Ws), dtype=jnp.float32)
    x = x.astype(jnp.bfloat16).astype(jnp.float32)
    proj_w = 0.1 * jax.random.normal(kw, (E, Cin, P, P), dtype=jnp.float32)
    proj_w = proj_w.astype(jnp.bfloat16).astype(jnp.float32)
    gamma = 1.0 + 0.1 * jax.random.normal(kg, (E,), dtype=jnp.float32)
    beta = 0.1 * jax.random.normal(kb, (E,), dtype=jnp.float32)

    out, Hn, Wn = patch_embed(x, proj_w, gamma, beta, stride=P)
    out = jax.block_until_ready(out)

    ref, Hr, Wr = _ref_forward(x, proj_w, gamma, beta, stride=P)
    assert out.shape == (B, Hn * Wn, E)
    assert (Hn, Wn) == (Hr, Wr) == (Hs // P, Ws // P)
    assert bool(jnp.allclose(out, ref, atol=2e-4, rtol=2e-4)), "mismatch vs JAX reference"

    print("KERNEL_OK")
</pallas_src>

<mosaic_0001>
module attributes {stable_mosaic.version = 11 : i64} {
  func.func @_proj_ln_kernel(%arg0: i32, %arg1: memref<104x64xbf16, #tpu.memory_space<vmem>>, %arg2: memref<64x128xbf16, #tpu.memory_space<vmem>>, %arg3: memref<1x128xf32, #tpu.memory_space<vmem>>, %arg4: memref<1x128xf32, #tpu.memory_space<vmem>>, %arg5: memref<104x128xf32, #tpu.memory_space<vmem>>) attributes {dimension_semantics = [#tpu.dimension_semantics<parallel>], iteration_bounds = array<i64: 2>, scalar_prefetch = 0 : i64, scratch_operands = 0 : i64, tpu.core_type = #tpu.core_type<tc>, window_params = [{transform_indices = @transform_0, window_bounds = array<i64: 104, 64>}, {pipeline_mode = #tpu.pipeline_mode<synchronous>, transform_indices = @transform_1, window_bounds = array<i64: 64, 128>}, {pipeline_mode = #tpu.pipeline_mode<synchronous>, transform_indices = @transform_2, window_bounds = array<i64: 1, 128>}, {pipeline_mode = #tpu.pipeline_mode<synchronous>, transform_indices = @transform_3, window_bounds = array<i64: 1, 128>}, {transform_indices = @transform_4, window_bounds = array<i64: 104, 128>}]} {
    %c0 = arith.constant 0 : index
    %c0_0 = arith.constant 0 : index
    %0 = vector.load %arg1[%c0, %c0_0] : memref<104x64xbf16, #tpu.memory_space<vmem>>, vector<104x64xbf16>
    %c0_1 = arith.constant 0 : index
    %c0_2 = arith.constant 0 : index
    %1 = vector.load %arg2[%c0_1, %c0_2] : memref<64x128xbf16, #tpu.memory_space<vmem>>, vector<64x128xbf16>
    %cst = arith.constant dense<0.000000e+00> : vector<104x128xf32>
    %2 = tpu.matmul %0, %1, %cst {dimension_numbers = #tpu.dot_dimension_numbers<[1], [0], [0], [1], [0, 0, 1, 1], [], []>} : vector<104x64xbf16>, vector<64x128xbf16>, vector<104x128xf32> -> vector<104x128xf32>
    %cst_3 = arith.constant dense<0.000000e+00> : vector<104xf32>
    %3 = vector.multi_reduction <add>, %2, %cst_3 [1] : vector<104x128xf32> to vector<104xf32>
    %4 = vector.shape_cast %3 : vector<104xf32> to vector<104x1xf32>
    %cst_4 = arith.constant 1.280000e+02 : f32
    %5 = vector.broadcast %cst_4 : f32 to vector<104x1xf32>
    %6 = arith.divf %4, %5 : vector<104x1xf32>
    %7 = arith.mulf %2, %2 : vector<104x128xf32>
    %cst_5 = arith.constant dense<0.000000e+00> : vector<104xf32>
    %8 = vector.multi_reduction <add>, %7, %cst_5 [1] : vector<104x128xf32> to vector<104xf32>
    %9 = vector.shape_cast %8 : vector<104xf32> to vector<104x1xf32>
    %cst_6 = arith.constant 1.280000e+02 : f32
    %10 = vector.broadcast %cst_6 : f32 to vector<104x1xf32>
    %11 = arith.divf %9, %10 : vector<104x1xf32>
    %12 = arith.mulf %6, %6 : vector<104x1xf32>
    %13 = arith.subf %11, %12 : vector<104x1xf32>
    %cst_7 = arith.constant 0.000000e+00 : f32
    %14 = vector.broadcast %cst_7 : f32 to vector<104x1xf32>
    %15 = arith.maximumf %13, %14 : vector<104x1xf32>
    %cst_8 = arith.constant 9.99999974E-6 : f32
    %16 = vector.broadcast %cst_8 : f32 to vector<104x1xf32>
    %17 = arith.addf %15, %16 : vector<104x1xf32>
    %18 = math.rsqrt %17 : vector<104x1xf32>
    %19 = vector.broadcast %6 : vector<104x1xf32> to vector<104x128xf32>
    %20 = arith.subf %2, %19 : vector<104x128xf32>
    %21 = vector.broadcast %18 : vector<104x1xf32> to vector<104x128xf32>
    %22 = arith.mulf %20, %21 : vector<104x128xf32>
    %c0_9 = arith.constant 0 : index
    %c0_10 = arith.constant 0 : index
    %23 = vector.load %arg3[%c0_9, %c0_10] : memref<1x128xf32, #tpu.memory_space<vmem>>, vector<1x128xf32>
    %24 = vector.broadcast %23 : vector<1x128xf32> to vector<104x128xf32>
    %25 = arith.mulf %22, %24 : vector<104x128xf32>
    %c0_11 = arith.constant 0 : index
    %c0_12 = arith.constant 0 : index
    %26 = vector.load %arg4[%c0_11, %c0_12] : memref<1x128xf32, #tpu.memory_space<vmem>>, vector<1x128xf32>
    %27 = vector.broadcast %26 : vector<1x128xf32> to vector<104x128xf32>
    %28 = arith.addf %25, %27 : vector<104x128xf32>
    %c0_13 = arith.constant 0 : index
    %c0_14 = arith.constant 0 : index
    %29 = vector.load %arg5[%c0_13, %c0_14] : memref<104x128xf32, #tpu.memory_space<vmem>>, vector<104x128xf32>
    tpu.vector_store %arg5[%c0_13, %c0_14], %28 {strides = array<i32>} : memref<104x128xf32, #tpu.memory_space<vmem>>, vector<104x128xf32>,
    return
  }
  func.func @transform_0(%arg0: i32) -> (i32, i32) {
    %c0_i32 = arith.constant 0 : i32
    %c0_i32_0 = arith.constant 0 : i32
    return %arg0, %c0_i32 : i32, i32
  }
  func.func @transform_1(%arg0: i32) -> (i32, i32) {
    %c0_i32 = arith.constant 0 : i32
    %c0_i32_0 = arith.constant 0 : i32
    %c0_i32_1 = arith.constant 0 : i32
    return %c0_i32, %c0_i32_0 : i32, i32
  }
  func.func @transform_2(%arg0: i32) -> (i32, i32) {
    %c0_i32 = arith.constant 0 : i32
    %c0_i32_0 = arith.constant 0 : i32
    %c0_i32_1 = arith.constant 0 : i32
    return %c0_i32, %c0_i32_0 : i32, i32
  }
  func.func @transform_3(%arg0: i32) -> (i32, i32) {
    %c0_i32 = arith.constant 0 : i32
    %c0_i32_0 = arith.constant 0 : i32
    %c0_i32_1 = arith.constant 0 : i32
    return %c0_i32, %c0_i32_0 : i32, i32
  }
  func.func @transform_4(%arg0: i32) -> (i32, i32) {
    %c0_i32 = arith.constant 0 : i32
    %c0_i32_0 = arith.constant 0 : i32
    return %arg0, %c0_i32 : i32, i32
  }
}

module attributes {stable_mosaic.version = 11 : i64} {
  func.func @_proj_ln_kernel(%arg0: i32, %arg1: memref<104x64xbf16, #tpu.memory_space<vmem>>, %arg2: memref<64x128xbf16, #tpu.memory_space<vmem>>, %arg3: memref<1x128xf32, #tpu.memory_space<vmem>>, %arg4: memref<1x128xf32, #tpu.memory_space<vmem>>, %arg5: memref<104x128xf32, #tpu.memory_space<vmem>>) attributes {dimension_semantics = [#tpu.dimension_semantics<parallel>], iteration_bounds = array<i64: 2>, scalar_prefetch = 0 : i64, scratch_operands = 0 : i64, tpu.core_type = #tpu.core_type<tc>, window_params = [{transform_indices = @transform_0, window_bounds = array<i64: 104, 64>}, {pipeline_mode = #tpu.pipeline_mode<synchronous>, transform_indices = @transform_1, window_bounds = array<i64: 64, 128>}, {pipeline_mode = #tpu.pipeline_mode<synchronous>, transform_indices = @transform_2, window_bounds = array<i64: 1, 128>}, {pipeline_mode = #tpu.pipeline_mode<synchronous>, transform_indices = @transform_3, window_bounds = array<i64: 1, 128>}, {transform_indices = @transform_4, window_bounds = array<i64: 104, 128>}]} {
    %c0 = arith.constant 0 : index
    %c0_0 = arith.constant 0 : index
    %0 = vector.load %arg1[%c0, %c0_0] : memref<104x64xbf16, #tpu.memory_space<vmem>>, vector<104x64xbf16>
    %c0_1 = arith.constant 0 : index
    %c0_2 = arith.constant 0 : index
    %1 = vector.load %arg2[%c0_1, %c0_2] : memref<64x128xbf16, #tpu.memory_space<vmem>>, vector<64x128xbf16>
    %cst = arith.constant dense<0.000000e+00> : vector<104x128xf32>
    %2 = tpu.matmul %0, %1, %cst {dimension_numbers = #tpu.dot_dimension_numbers<[1], [0], [0], [1], [0, 0, 1, 1], [], []>} : vector<104x64xbf16>, vector<64x128xbf16>, vector<104x128xf32> -> vector<104x128xf32>
    %cst_3 = arith.constant dense<0.000000e+00> : vector<104xf32>
    %3 = vector.multi_reduction <add>, %2, %cst_3 [1] : vector<104x128xf32> to vector<104xf32>
    %4 = vector.shape_cast %3 : vector<104xf32> to vector<104x1xf32>
    %cst_4 = arith.constant 1.280000e+02 : f32
    %5 = vector.broadcast %cst_4 : f32 to vector<104x1xf32>
    %6 = arith.divf %4, %5 : vector<104x1xf32>
    %7 = arith.mulf %2, %2 : vector<104x128xf32>
    %cst_5 = arith.constant dense<0.000000e+00> : vector<104xf32>
    %8 = vector.multi_reduction <add>, %7, %cst_5 [1] : vector<104x128xf32> to vector<104xf32>
    %9 = vector.shape_cast %8 : vector<104xf32> to vector<104x1xf32>
    %cst_6 = arith.constant 1.280000e+02 : f32
    %10 = vector.broadcast %cst_6 : f32 to vector<104x1xf32>
    %11 = arith.divf %9, %10 : vector<104x1xf32>
    %12 = arith.mulf %6, %6 : vector<104x1xf32>
    %13 = arith.subf %11, %12 : vector<104x1xf32>
    %cst_7 = arith.constant 0.000000e+00 : f32
    %14 = vector.broadcast %cst_7 : f32 to vector<104x1xf32>
    %15 = arith.maximumf %13, %14 : vector<104x1xf32>
    %cst_8 = arith.constant 9.99999974E-6 : f32
    %16 = vector.broadcast %cst_8 : f32 to vector<104x1xf32>
    %17 = arith.addf %15, %16 : vector<104x1xf32>
    %18 = math.rsqrt %17 : vector<104x1xf32>
    %19 = vector.broadcast %6 : vector<104x1xf32> to vector<104x128xf32>
    %20 = arith.subf %2, %19 : vector<104x128xf32>
    %21 = vector.broadcast %18 : vector<104x1xf32> to vector<104x128xf32>
    %22 = arith.mulf %20, %21 : vector<104x128xf32>
    %c0_9 = arith.constant 0 : index
    %c0_10 = arith.constant 0 : index
    %23 = vector.load %arg3[%c0_9, %c0_10] : memref<1x128xf32, #tpu.memory_space<vmem>>, vector<1x128xf32>
    %24 = vector.broadcast %23 : vector<1x128xf32> to vector<104x128xf32>
    %25 = arith.mulf %22, %24 : vector<104x128xf32>
    %c0_11 = arith.constant 0 : index
    %c0_12 = arith.constant 0 : index
    %26 = vector.load %arg4[%c0_11, %c0_12] : memref<1x128xf32, #tpu.memory_space<vmem>>, vector<1x128xf32>
    %27 = vector.broadcast %26 : vector<1x128xf32> to vector<104x128xf32>
    %28 = arith.addf %25, %27 : vector<104x128xf32>
    %c0_13 = arith.constant 0 : index
    %c0_14 = arith.constant 0 : index
    %29 = vector.load %arg5[%c0_13, %c0_14] : memref<104x128xf32, #tpu.memory_space<vmem>>, vector<104x128xf32>
    tpu.vector_store %arg5[%c0_13, %c0_14], %28 {strides = array<i32>} : memref<104x128xf32, #tpu.memory_space<vmem>>, vector<104x128xf32>,
    return
  }
  func.func @transform_0(%arg0: i32) -> (i32, i32) {
    %c0_i32 = arith.constant 0 : i32
    %c0_i32_0 = arith.constant 0 : i32
    return %arg0, %c0_i32 : i32, i32
  }
  func.func @transform_1(%arg0: i32) -> (i32, i32) {
    %c0_i32 = arith.constant 0 : i32
    %c0_i32_0 = arith.constant 0 : i32
    %c0_i32_1 = arith.constant 0 : i32
    return %c0_i32, %c0_i32_0 : i32, i32
  }
  func.func @transform_2(%arg0: i32) -> (i32, i32) {
    %c0_i32 = arith.constant 0 : i32
    %c0_i32_0 = arith.constant 0 : i32
    %c0_i32_1 = arith.constant 0 : i32
    return %c0_i32, %c0_i32_0 : i32, i32
  }
  func.func @transform_3(%arg0: i32) -> (i32, i32) {
    %c0_i32 = arith.constant 0 : i32
    %c0_i32_0 = arith.constant 0 : i32
    %c0_i32_1 = arith.constant 0 : i32
    return %c0_i32, %c0_i32_0 : i32, i32
  }
  func.func @transform_4(%arg0: i32) -> (i32, i32) {
    %c0_i32 = arith.constant 0 : i32
    %c0_i32_0 = arith.constant 0 : i32
    return %arg0, %c0_i32 : i32, i32
  }
}

</mosaic_0001>

<bundles_post_ra>
// kernel: tpu_custom_call.1
= control target key start
LH: loop header
LB: loop body
LE: loop exit
PB: predicated region body
PF: predicated region fallthrough
CT: control target
= control target key end

     0   :  { %9 = vsyncpa [#allocation3], 0  ;;  %s1500_s0 = inlined_call_operand.vmem [shape: bf16[200,64], index: 0, kind: input, shape index: {}]   ;;  %s1501_s1 = inlined_call_operand.vmem [shape: bf16[64,128], index: 1, kind: input, shape index: {}]   ;;  %s1502_s2 = inlined_call_operand.vmem [shape: f32[1,128], index: 2, kind: input, shape index: {}]   ;;  %s1503_s3 = inlined_call_operand.vmem [shape: f32[1,128], index: 3, kind: input, shape index: {}]   ;;  %s1504_s4 = inlined_call_operand.hbm [shape: f32[200,128], index: 4, kind: output, shape index: {}]  }
   0x1   :  { %11 = vsyncpa [#allocation3 + $0x1], 0  ;;  %s1063_s15 = smov 0   ;;  %s1065_s16 = smov 0  }
   0x2   :  { %s1067_s17 = smov 0   ;;  %s1069_s18 = smov 0  }
   0x3 LB: > { %s1084_s19 = sadd.s32 4294967295, %s1032_s18   ;;  %s805_s20 = sadd.s32 4294967294, %s1032_s18   ;;  %s1032_s18 = sphi %s1069_s18, %s1511_s18   ;;  %s1028_s17 = sphi %s1067_s17, %s1510_s17   ;;  %s1024_s16 = sphi %s1065_s16, %s1509_s16   ;;  %s1020_s15 = sphi %s1063_s15, %s1508_s15  }
   0x4   : > { %s1088_s21 = sadd.s32 1, %s1032_s18   ;;  %s113_s22 = sadd.s32 1, %s1028_s17 }
   0x5   : > { %s110_s23 = ssub.s32 %s1032_s18, %s1088_s21  ;;  %p123_p0 = scmp.ne.s32.totalorder %s1028_s17, %s1024_s16 }
   0x6   : > { %p111_p1 = scmp.eq.s32.totalorder %s110_s23, 0  ;;  %p124_p2 = scmp.eq.s32.totalorder %s1084_s19, 1 }
   0x7   : > { %p129_p3 = scmp.ne.s32.totalorder %s1024_s16, %s1020_s15  ;;  %p130_p4 = scmp.eq.s32.totalorder %s805_s20, 1 }
   0x8   : > { %s1099_s24 = scalar_select %p111_p1, %s1028_s17, %s113_s22  }
   0x9   : > { %p1101_p5 = por %p124_p2, %p123_p0  ;;  %p1105_p6 = por %p130_p4, %p129_p3 }
   0xa   : > { %p808_p7 = scmp.ge.s32.totalorder %s1032_s18, 1  ;;  %p174_p8 = scmp.lt.s32.totalorder %s1032_s18, 3 }
   0xc   : > { %p175_p9 = pnand %p808_p7, %p174_p8 }
   0xd   : > { %s1115_s29 = smul.u32 (!%p175_p9), 13, %s1084_s19  ;;  %s201_s20 = sand.u32 (!%p175_p9), 1, %s1024_s16  }
   0xe   : > { %178 = sbr.rel (%p175_p9) target bundleno = 407 (0x197), region = 36 }
   0xf   : > { %p209_p10 = scmp.lt.s32.totalorder (!%p175_p9), %s1115_s29, 24  ;;  %s887_s27 = smul.u32 (!%p175_p9), 104, %s201_s20 }
  0x11   : > { %s1266_s5 = scalar_lea.vmem (!%p175_p9), [#allocation2], %s887_s27 }
  0x13   : > { %v873_v0 = vld [vmem:[%s1501_s1 + $0x18] sm:$0xff]  ;;  %v872_v1 = vld [vmem:[%s1501_s1 + $0x10] sm:$0xff]  ;;  %s210_s6 = scalar_select %p209_p10, %s1115_s29, 24  ;;  %v871_v2 = vld [vmem:[%s1501_s1 + $0x8] sm:$0xff]  ;;  %vm302_vm0 = vcmask 523264   ;;  %v1034_v40 = vmov 128.0  }
  0x14   : > { %328 = vmatpush.bf16.msra.mxu0 %v873_v0  ;;  %875 = vmatpush.bf16.msra.mxu1 %v873_v0  ;;  %v870_v3 = vld [vmem:[%s1501_s1] sm:$0xff]  ;;  %931 = vrcp.f32 %v1034_v40  ;;  %s729_s7 = ssub.s32 (%p1101_p5), 25, %s1115_s29 }
  0x15   : > { %877 = vmatpush.bf16.msra.mxu3 %v873_v0  ;;  %876 = vmatpush.bf16.msra.mxu2 %v873_v0  ;;  %s809_s9 = sshll.u32 %s210_s6, 2  ;;  %s1439_s6 = scalar_lea.sflag [#allocation3], %s201_s20 }
  0x16   : > { %s212_s14 = scalar_lea.vmem %s1500_s0, %s809_s9  ;;  %p730_p11 = scmp.lt.s32.totalorder (%p1101_p5), %s729_s7, 13 }
  0x17   : > { %v864_v4 = vld [vmem:[%s212_s14] sm:$0xff]  ;;  %v866_v5 = vld [vmem:[%s212_s14 + $0x10] sm:$0xff]  ;;  %v869_v6 = vld [vmem:[%s212_s14 + $0x28] sm:$0xff] }
  0x18   : > { %329 = vmatpush.bf16.msra.mxu0 %v872_v1  ;;  %878 = vmatpush.bf16.msra.mxu1 %v872_v1  ;;  %v868_v7 = vld [vmem:[%s212_s14 + $0x20] sm:$0xff]  ;;  %v236_v8 = vld [vmem:[%s212_s14 + $0x30] sm:$0xf]  ;;  %v865_v10 = vld [vmem:[%s212_s14 + $0x8] sm:$0xff] }
  0x19   : > { %880 = vmatpush.bf16.msra.mxu3 %v872_v1  ;;  %879 = vmatpush.bf16.msra.mxu2 %v872_v1  ;;  %v270_v9 = vunpack.c.l.b16 %v236_v8  ;;  %v867_v11 = vld [vmem:[%s212_s14 + $0x18] sm:$0xff] }
  0x1a   : > { %v932_v41 = vpop.eup %931 }
  0x1b   : > { %v277_v12 = vpack.c.b16 %v270_v9, %v270_v9  ;;  %v394_v42 = vmul.f32 128.0, %v932_v41  ;;  %vm398_vm1 = vweird.f32 %v932_v41 }
  0x1c   : > { %330 = vmatpush.bf16.msra.mxu0 %v871_v2  ;;  %881 = vmatpush.bf16.msra.mxu1 %v871_v2 }
  0x1d   : > { %883 = vmatpush.bf16.msra.mxu3 %v871_v2  ;;  %882 = vmatpush.bf16.msra.mxu2 %v871_v2  ;;  %v395_v43 = vsub.f32 1.0, %v394_v42 }
  0x1f   : > { %v396_v44 = vmul.f32 %v932_v41, %v395_v43  ;;  %v1244_v43 = vld [vmem:[%s1503_s3] ss:$0 sm:$0xff] }
  0x20   : > { %331 = vmatpush.bf16.msra.mxu0 %v870_v3  ;;  %884 = vmatpush.bf16.msra.mxu1 %v870_v3 }
  0x21   : > { %886 = vmatpush.bf16.msra.mxu3 %v870_v3  ;;  %885 = vmatpush.bf16.msra.mxu2 %v870_v3  ;;  %v397_v45 = vadd.f32 %v932_v41, %v396_v44 }
  0x23   : > { %850 = vmatmul.msk.bf16.vlgmr.msra.gmra.mxu0 %vm302_vm0, %v864_v4  ;;  %852 = vmatmul.msk.bf16.vlgmr.msra.gmra.mxu1 %vm302_vm0, %v866_v5  ;;  %v1204_v46 = vsel %vm398_vm1, %v932_v41, %v397_v45 }
  0x24   : > { %855 = vmatmul.msk.bf16.vlgmr.msra.gmra.mxu3 %vm302_vm0, %v869_v6  ;;  %854 = vmatmul.msk.bf16.vlgmr.msra.gmra.mxu2 %vm302_vm0, %v868_v7 }
  0x33   : > { %851 = vmatmul.msk.bf16.gmra.mxu0 %vm302_vm0, %v865_v10  ;;  %853 = vmatmul.msk.bf16.gmra.mxu1 %vm302_vm0, %v867_v11 }
  0x34   : > { %856 = vmatmul.msk.bf16.gmra.mxu3 %vm302_vm0, %v277_v12 }
  0xa0   : > { %v1138_v13 = vpop.f32.mrf.mxu0  ;;  %v1140_v14 = vpop.f32.mrf.mxu1 }
  0xa1   : > { %375 = vadd.xlane.f32.xlu2 %v1140_v14  ;;  %367 = vadd.xlane.f32.xlu0 %v1138_v13  ;;  %v413_v15 = vmul.f32 %v1138_v13, %v1138_v13  ;;  %v417_v16 = vmul.f32 %v1140_v14, %v1140_v14 }
  0xa3   : > { %426 = vadd.xlane.f32.xlu1 %v413_v15 }
  0xa7   : > { %v1148_v17 = vpop.f32.mrf.mxu3  ;;  %v1154_v19 = vpop.f32.mrf.mxu2 }
  0xa8   : > { %v1150_v18 = vpop.f32.mrf.mxu0  ;;  %v421_v20 = vmul.f32 %v1154_v19, %v1154_v19  ;;  %v1164_v23 = vpop.f32.mrf.mxu1  ;;  %v423_v36 = vmul.f32 %v1148_v17, %v1148_v17 }
  0xa9   : > { %434 = vadd.xlane.f32.xlu2 %v417_v16  ;;  %369 = vadd.xlane.f32.xlu0 %v1150_v18  ;;  %v418_v25 = vmul.f32 %v1164_v23, %v1164_v23  ;;  %v414_v29 = vmul.f32 %v1150_v18, %v1150_v18 }
  0xab   : > { %387 = vadd.xlane.f32.xlu1 %v1148_v17 }
  0xaf   : > { %v1158_v21 = vpop.f32.mrf.mxu3  ;;  %v1166_v24 = vpop.f32.mrf.mxu2 }
  0xb0   : > { %v1161_v22 = vpop.f32.mrf.mxu0  ;;  %v422_v27 = vmul.f32 %v1166_v24, %v1166_v24  ;;  %v1176_v28 = vpop.f32.mrf.mxu1  ;;  %v424_v38 = vmul.f32 %v1158_v21, %v1158_v21 }
  0xb1   : > { %383 = vadd.xlane.f32.xlu2 %v1154_v19  ;;  %442 = vadd.xlane.f32.xlu0 %v421_v20  ;;  %v419_v30 = vmul.f32 %v1176_v28, %v1176_v28  ;;  %v415_v35 = vmul.f32 %v1161_v22, %v1161_v22 }
  0xb3   : > { %371 = vadd.xlane.f32.xlu1 %v1161_v22 }
  0xb7   : > { %v1170_v26 = vpop.f32.mrf.mxu3 }
  0xb8   : > { %v1185_v32 = vpop.f32.mrf.mxu0  ;;  %v1188_v33 = vpop.f32.mrf.mxu1  ;;  %v425_v39 = vmul.f32 %v1170_v26, %v1170_v26 }
  0xb9   : > { %377 = vadd.xlane.f32.xlu2 %v1164_v23  ;;  %436 = vadd.xlane.f32.xlu0 %v418_v25  ;;  %v420_v34 = vmul.f32 %v1188_v33, %v1188_v33  ;;  %v416_v37 = vmul.f32 %v1185_v32, %v1185_v32 }
  0xbb   : > { %444 = vadd.xlane.f32.xlu1 %v422_v27 }
  0xbf   : > { %v365_v31 = vpop.f32.mrf.mxu3 }
  0xc1   : > { %385 = vadd.xlane.f32.xlu0 %v1166_v24  ;;  %428 = vadd.xlane.f32.xlu2 %v414_v29 }
  0xc3   : > { %438 = vadd.xlane.f32.xlu1 %v419_v30 }
  0xc9   : > { %379 = vadd.xlane.f32.xlu0 %v1176_v28  ;;  %389 = vadd.xlane.f32.xlu2 %v1158_v21 }
  0xcb   : > { %373 = vadd.xlane.f32.xlu1 %v1185_v32 }
  0xd1   : > { %440 = vadd.xlane.f32.xlu2 %v420_v34  ;;  %430 = vadd.xlane.f32.xlu0 %v415_v35 }
  0xd3   : > { %381 = vadd.xlane.f32.xlu1 %v1188_v33 }
  0xd9   : > { %446 = vadd.xlane.f32.xlu2 %v423_v36  ;;  %391 = vadd.xlane.f32.xlu0 %v1170_v26 }
  0xdb   : > { %432 = vadd.xlane.f32.xlu1 %v416_v37 }
  0xe1   : > { %448 = vadd.xlane.f32.xlu0 %v424_v38 }
  0xe3   : > { %450 = vadd.xlane.f32.xlu1 %v425_v39  ;;  %v1237_v39 = vld [vmem:[%s1502_s2] ss:$0 sm:$0xff] }
 0x114   : > { %v376_v47 = vpop.xlane.xlu2 %375  ;;  %v368_v48 = vpop.xlane.xlu0 %367 }
 0x115   : > { %v400_v49 = vmul.f32 %v1204_v46, %v368_v48  ;;  %v1209_v53 = vmul.f32 %v1204_v46, %v376_v47 }
 0x116   : > { %v427_v50 = vpop.xlane.xlu1 %426 }
 0x117   : > { %v465_v51 = vmul.f32 %v400_v49, %v400_v49  ;;  %v452_v52 = vmul.f32 %v427_v50, %v1204_v46  ;;  %v469_v55 = vmul.f32 %v1209_v53, %v1209_v53  ;;  %v647_v38 = vsub.f32 %v1138_v13, %v400_v49 }
 0x119   : > { %v478_v54 = vsub.f32 %v452_v52, %v465_v51 }
 0x11b   : > { %v491_v56 = vmax.f32 %v478_v54, 0.0  ;;  %v651_v54 = vsub.f32 %v1140_v14, %v1209_v53 }
 0x11c   : > { %v435_v57 = vpop.xlane.xlu2 %434  ;;  %v370_v58 = vpop.xlane.xlu0 %369 }
 0x11d   : > { %v456_v59 = vmul.f32 %v435_v57, %v1204_v46  ;;  %v504_v60 = vadd.f32 1e-05, %v491_v56  ;;  %v1247_v13 = vmul.f32 %v1204_v46, %v370_v58 }
 0x11e   : > { %v1214_v61 = vpop.xlane.xlu1 %387 }
 0x11f   : > { %v482_v62 = vsub.f32 %v456_v59, %v469_v55  ;;  %933 = vrsqrt.f32 %v504_v60  ;;  %vm523_vm3 = vweird.f32 %v504_v60 }
 0x121   : > { %v495_v63 = vmax.f32 %v482_v62, 0.0 }
 0x123   : > { %v508_v0 = vadd.f32 1e-05, %v495_v63 }
 0x124   : > { %v384_v1 = vpop.xlane.xlu2 %383  ;;  %v443_v2 = vpop.xlane.xlu0 %442 }
 0x125   : > { %935 = vrsqrt.f32 %v508_v0  ;;  %v1217_v3 = vmul.f32 %v1204_v46, %v384_v1  ;;  %v460_v4 = vmul.f32 %v443_v2, %v1204_v46  ;;  %v934_v5 = vpop.eup %933  ;;  %vm563_vm6 = vweird.f32 %v508_v0 }
 0x126   : > { %v1220_v6 = vpop.xlane.xlu1 %371  ;;  %v518_v7 = vmul.f32 %v934_v5, %v504_v60  ;;  %vm524_vm2 = vweird.f32 %v934_v5  ;;  %v466_v60 = vmul.f32 %v1247_v13, %v1247_v13 }
 0x127   : > { %v473_v8 = vmul.f32 %v1217_v3, %v1217_v3  ;;  %vm525_vm4 = vmor %vm523_vm3, %vm524_vm2 }
 0x128   : > { %v519_v9 = vmul.f32 %v934_v5, %v518_v7 }
 0x129   : > { %v486_v10 = vsub.f32 %v460_v4, %v473_v8 }
 0x12a   : > { %v520_v12 = vmul.f32 0.5, %v519_v9 }
 0x12b   : > { %v936_v11 = vpop.eup %935  ;;  %v499_v15 = vmax.f32 %v486_v10, 0.0 }
 0x12c   : > { %v558_v16 = vmul.f32 %v936_v11, %v508_v0  ;;  %v378_v20 = vpop.xlane.xlu2 %377  ;;  %v437_v25 = vpop.xlane.xlu0 %436  ;;  %v521_v27 = vsub.f32 1.5, %v520_v12  ;;  %vm564_vm5 = vweird.f32 %v936_v11 }
 0x12d   : > { %v1224_v29 = vadd.f32 1e-05, %v499_v15  ;;  %v1227_v30 = vmul.f32 %v1204_v46, %v378_v20  ;;  %v457_v37 = vmul.f32 %v437_v25, %v1204_v46  ;;  %vm565_vm7 = vmor %vm563_vm6, %vm564_vm5 }
 0x12e   : > { %v559_v31 = vmul.f32 %v936_v11, %v558_v16  ;;  %v445_v34 = vpop.xlane.xlu1 %444  ;;  %v522_v35 = vmul.f32 %v934_v5, %v521_v27 }
 0x12f   : > { %937 = vrsqrt.f32 %v1224_v29  ;;  %v470_v36 = vmul.f32 %v1227_v30, %v1227_v30  ;;  %v461_v14 = vmul.f32 %v445_v34, %v1204_v46  ;;  %vm603_vm9 = vweird.f32 %v1224_v29 }
 0x130   : > { %v560_v40 = vmul.f32 0.5, %v559_v31  ;;  %v526_v41 = vsel %vm525_vm4, %v934_v5, %v522_v35 }
 0x131   : > { %v483_v42 = vsub.f32 %v457_v37, %v470_v36  ;;  %v660_v44 = vmul.f32 %v647_v38, %v526_v41  ;;  %v655_v36 = vsub.f32 %v1154_v19, %v1217_v3 }
 0x132   : > { %v561_v45 = vsub.f32 1.5, %v560_v40 }
 0x133   : > { %v496_v47 = vmax.f32 %v483_v42, 0.0  ;;  %v677_v48 = vmul.f32 %v1237_v39, %v660_v44  ;;  %v1294_v44 = vmul.f32 %v1204_v46, %v1220_v6  ;;  %v648_v6 = vsub.f32 %v1150_v18, %v1247_v13 }
 0x134   : > { %v562_v49 = vmul.f32 %v936_v11, %v561_v45  ;;  %v386_v50 = vpop.xlane.xlu0 %385  ;;  %v429_v51 = vpop.xlane.xlu2 %428  ;;  %v652_v18 = vsub.f32 %v1164_v23, %v1227_v30 }
 0x135   : > { %v938_v52 = vpop.eup %937  ;;  %v1252_v55 = vadd.f32 1e-05, %v496_v47  ;;  %v1255_v56 = vmul.f32 %v1204_v46, %v386_v50  ;;  %v453_v57 = vmul.f32 %v429_v51, %v1204_v46  ;;  %v694_v58 = vadd.f32 %v1244_v43, %v677_v48 }
 0x136   : > { %v566_v59 = vsel %vm565_vm7, %v936_v11, %v562_v49  ;;  %v598_v62 = vmul.f32 %v938_v52, %v1224_v29  ;;  %v439_v63 = vpop.xlane.xlu1 %438  ;;  %vm604_vm8 = vweird.f32 %v938_v52  ;;  %v1301_v48 = vmul.f32 %v1204_v46, %v1214_v61 }
 0x137   : > { %v664_v0 = vmul.f32 %v651_v54, %v566_v59  ;;  %939 = vrsqrt.f32 %v1252_v55  ;;  %v474_v53 = vmul.f32 %v1255_v56, %v1255_v56  ;;  %707 = vst [vmem:[%s1266_s5] sm:$0xff] %v694_v58  ;;  %v479_v2 = vsub.f32 %v453_v57, %v466_v60  ;;  %vm605_vm10 = vmor %vm603_vm9, %vm604_vm8 }
 0x138   : > { %v599_v1 = vmul.f32 %v938_v52, %v598_v62  ;;  %v458_v37 = vmul.f32 %v439_v63, %v1204_v46  ;;  %v467_v59 = vmul.f32 %v1294_v44, %v1294_v44  ;;  %vm573_vm12 = vweird.f32 %v1252_v55 }
 0x139   : > { %v681_v4 = vmul.f32 %v1237_v39, %v664_v0  ;;  %v487_v5 = vsub.f32 %v461_v14, %v474_v53  ;;  %v492_v8 = vmax.f32 %v479_v2, 0.0  ;;  %v475_v0 = vmul.f32 %v1301_v48, %v1301_v48 }
 0x13a   : > { %v600_v7 = vmul.f32 0.5, %v599_v1  ;;  %v656_v23 = vsub.f32 %v1166_v24, %v1255_v56 }
 0x13b   : > { %v698_v9 = vadd.f32 %v1244_v43, %v681_v4  ;;  %v500_v10 = vmax.f32 %v487_v5, 0.0  ;;  %v1271_v12 = vadd.f32 1e-05, %v492_v8 }
 0x13c   : > { %v601_v11 = vsub.f32 1.5, %v600_v7  ;;  %v380_v15 = vpop.xlane.xlu0 %379  ;;  %v1273_v16 = vpop.xlane.xlu2 %389 }
 0x13d   : > { %v940_v20 = vpop.eup %939  ;;  %711 = vst [vmem:[%s1266_s5 + $0x20] sm:$0xff] %v698_v9  ;;  %v1276_v25 = vadd.f32 1e-05, %v500_v10  ;;  %v1279_v27 = vmul.f32 %v1204_v46, %v380_v15  ;;  %941 = vrsqrt.f32 %v1271_v12  ;;  %vm533_vm1 = vweird.f32 %v1271_v12 }
 0x13e   : > { %v602_v31 = vmul.f32 %v938_v52, %v601_v11  ;;  %v568_v34 = vmul.f32 %v940_v20, %v1252_v55  ;;  %v1284_v35 = vpop.xlane.xlu1 %373  ;;  %vm574_vm11 = vweird.f32 %v940_v20 }
 0x13f   : > { %943 = vrsqrt.f32 %v1276_v25  ;;  %v471_v38 = vmul.f32 %v1279_v27, %v1279_v27  ;;  %vm575_vm13 = vmor %vm573_vm12, %vm574_vm11  ;;  %vm613_vm14 = vweird.f32 %v1276_v25 }
 0x140   : > { %v606_v40 = vsel %vm605_vm10, %v938_v52, %v602_v31  ;;  %v569_v41 = vmul.f32 %v940_v20, %v568_v34 }
 0x141   : > { %v668_v29 = vmul.f32 %v655_v36, %v606_v40  ;;  %v484_v42 = vsub.f32 %v458_v37, %v471_v38 }
 0x142   : > { %v570_v45 = vmul.f32 0.5, %v569_v41  ;;  %v1343_v41 = vmul.f32 %v1204_v46, %v1284_v35 }
 0x143   : > { %v685_v47 = vmul.f32 %v1237_v39, %v668_v29  ;;  %v497_v19 = vmax.f32 %v484_v42, 0.0  ;;  %v1297_v3 = vpop.eup %941 }
 0x144   : > { %v571_v49 = vsub.f32 1.5, %v570_v45  ;;  %v441_v50 = vpop.xlane.xlu2 %440  ;;  %v431_v51 = vpop.xlane.xlu0 %430  ;;  %v528_v57 = vmul.f32 %v1297_v3, %v1271_v12  ;;  %vm534_vm15 = vweird.f32 %v1297_v3  ;;  %v1352_v45 = vmul.f32 %v1204_v46, %v1273_v16 }
 0x145   : > { %v944_v52 = vpop.eup %943  ;;  %v702_v54 = vadd.f32 %v1244_v43, %v685_v47  ;;  %v1308_v58 = vadd.f32 1e-05, %v497_v19  ;;  %v454_v63 = vmul.f32 %v431_v51, %v1204_v46  ;;  %v459_v5 = vmul.f32 %v441_v50, %v1204_v46  ;;  %vm535_vm2 = vmor %vm533_vm1, %vm534_vm15 }
 0x146   : > { %v572_v61 = vmul.f32 %v940_v20, %v571_v49  ;;  %v608_v60 = vmul.f32 %v944_v52, %v1276_v25  ;;  %v382_v62 = vpop.xlane.xlu1 %381  ;;  %v529_v13 = vmul.f32 %v1297_v3, %v528_v57  ;;  %vm614_vm0 = vweird.f32 %v944_v52 }
 0x147   : > { %715 = vst [vmem:[%s1266_s5 + $0x40] sm:$0xff] %v702_v54  ;;  %945 = vrsqrt.f32 %v1308_v58  ;;  %v1324_v53 = vmul.f32 %v1204_v46, %v382_v62  ;;  %v480_v2 = vsub.f32 %v454_v63, %v467_v59  ;;  %vm615_vm3 = vmor %vm613_vm14, %vm614_vm0  ;;  %v468_v16 = vmul.f32 %v1343_v41, %v1343_v41 }
 0x148   : > { %v576_v14 = vsel %vm575_vm13, %v940_v20, %v572_v61  ;;  %v609_v55 = vmul.f32 %v944_v52, %v608_v60  ;;  %v530_v30 = vmul.f32 0.5, %v529_v13  ;;  %vm583_vm5 = vweird.f32 %v1308_v58 }
 0x149   : > { %v665_v1 = vmul.f32 %v652_v18, %v576_v14  ;;  %v472_v7 = vmul.f32 %v1324_v53, %v1324_v53  ;;  %v493_v10 = vmax.f32 %v480_v2, 0.0  ;;  %v653_v2 = vsub.f32 %v1176_v28, %v1279_v27 }
 0x14a   : > { %v610_v4 = vmul.f32 0.5, %v609_v55  ;;  %v531_v9 = vsub.f32 1.5, %v530_v30 }
 0x14b   : > { %v682_v8 = vmul.f32 %v1237_v39, %v665_v1  ;;  %v485_v24 = vsub.f32 %v459_v5, %v472_v7  ;;  %v1337_v36 = vadd.f32 1e-05, %v493_v10 }
 0x14c   : > { %v611_v11 = vsub.f32 1.5, %v610_v4  ;;  %v447_v56 = vpop.xlane.xlu2 %446  ;;  %v392_v15 = vpop.xlane.xlu0 %391  ;;  %v532_v34 = vmul.f32 %v1297_v3, %v531_v9 }
 0x14d   : > { %v946_v20 = vpop.eup %945  ;;  %v699_v31 = vadd.f32 %v1244_v43, %v682_v8  ;;  %v462_v37 = vmul.f32 %v447_v56, %v1204_v46  ;;  %v498_v12 = vmax.f32 %v485_v24, 0.0  ;;  %947 = vrsqrt.f32 %v1337_v36 }
 0x14e   : > { %v612_v38 = vmul.f32 %v944_v52, %v611_v11  ;;  %v578_v40 = vmul.f32 %v946_v20, %v1308_v58  ;;  %v433_v29 = vpop.xlane.xlu1 %432  ;;  %v536_v42 = vsel %vm535_vm2, %v1297_v3, %v532_v34  ;;  %vm584_vm4 = vweird.f32 %v946_v20 }
 0x14f   : > { %712 = vst [vmem:[%s1266_s5 + $0x28] sm:$0xff] %v699_v31  ;;  %v488_v47 = vsub.f32 %v462_v37, %v475_v0  ;;  %v661_v49 = vmul.f32 %v648_v6, %v536_v42  ;;  %v1355_v50 = vadd.f32 1e-05, %v498_v12  ;;  %v455_v57 = vmul.f32 %v433_v29, %v1204_v46  ;;  %vm585_vm6 = vmor %vm583_vm5, %vm584_vm4 }
 0x150   : > { %v616_v19 = vsel %vm615_vm3, %v944_v52, %v612_v38  ;;  %v579_v35 = vmul.f32 %v946_v20, %v578_v40  ;;  %v476_v52 = vmul.f32 %v1352_v45, %v1352_v45  ;;  %v1375_v1 = vmul.f32 %v1204_v46, %v392_v15 }
 0x151   : > { %v669_v51 = vmul.f32 %v656_v23, %v616_v19  ;;  %v501_v54 = vmax.f32 %v488_v47, 0.0  ;;  %v678_v25 = vmul.f32 %v1237_v39, %v661_v49  ;;  %949 = vrsqrt.f32 %v1355_v50 }
 0x152   : > { %v580_v59 = vmul.f32 0.5, %v579_v35  ;;  %v481_v62 = vsub.f32 %v455_v57, %v468_v16  ;;  %v477_v9 = vmul.f32 %v1375_v1, %v1375_v1  ;;  %vm543_vm8 = vweird.f32 %v1337_v36 }
 0x153   : > { %v686_v3 = vmul.f32 %v1237_v39, %v669_v51  ;;  %v1365_v6 = vadd.f32 1e-05, %v501_v54  ;;  %v695_v61 = vadd.f32 %v1244_v43, %v678_v25  ;;  %v948_v13 = vpop.eup %947  ;;  %v649_v19 = vsub.f32 %v1161_v22, %v1294_v44 }
 0x154   : > { %v581_v60 = vsub.f32 1.5, %v580_v59  ;;  %v449_v18 = vpop.xlane.xlu0 %448  ;;  %v538_v55 = vmul.f32 %v948_v13, %v1337_v36  ;;  %v494_v23 = vmax.f32 %v481_v62, 0.0  ;;  %vm544_vm7 = vweird.f32 %v948_v13 }
 0x155   : > { %v703_v63 = vadd.f32 %v1244_v43, %v686_v3  ;;  %951 = vrsqrt.f32 %v1365_v6  ;;  %v463_v0 = vmul.f32 %v449_v18, %v1204_v46  ;;  %708 = vst [vmem:[%s1266_s5 + $0x8] sm:$0xff] %v695_v61  ;;  %vm545_vm9 = vmor %vm543_vm8, %vm544_vm7  ;;  %vm593_vm11 = vweird.f32 %v1355_v50 }
 0x156   : > { %v582_v14 = vmul.f32 %v946_v20, %v581_v60  ;;  %v451_v30 = vpop.xlane.xlu1 %450  ;;  %v539_v8 = vmul.f32 %v948_v13, %v538_v55  ;;  %v1384_v10 = vadd.f32 1e-05, %v494_v23  ;;  %v654_v59 = vsub.f32 %v1188_v33, %v1324_v53 }
 0x157   : > { %716 = vst [vmem:[%s1266_s5 + $0x48] sm:$0xff] %v703_v63  ;;  %v489_v58 = vsub.f32 %v463_v0, %v476_v52  ;;  %v464_v4 = vmul.f32 %v451_v30, %v1204_v46  ;;  %v950_v5 = vpop.eup %949  ;;  %vm623_vm14 = vweird.f32 %v1365_v6  ;;  %v657_v62 = vsub.f32 %v1148_v17, %v1301_v48 }
 0x158   : > { %v586_v7 = vsel %vm585_vm6, %v946_v20, %v582_v14  ;;  %v588_v24 = vmul.f32 %v950_v5, %v1355_v50  ;;  %v540_v15 = vmul.f32 0.5, %v539_v8  ;;  %953 = vrsqrt.f32 %v1384_v10 }
 0x159   : > { %v666_v11 = vmul.f32 %v653_v2, %v586_v7  ;;  %v502_v56 = vmax.f32 %v489_v58, 0.0  ;;  %v490_v31 = vsub.f32 %v464_v4, %v477_v9  ;;  %vm594_vm10 = vweird.f32 %v950_v5 }
 0x15a   : > { %v589_v27 = vmul.f32 %v950_v5, %v588_v24  ;;  %v541_v34 = vsub.f32 1.5, %v540_v15  ;;  %vm595_vm12 = vmor %vm593_vm11, %vm594_vm10  ;;  %vm553_vm1 = vweird.f32 %v1384_v10  ;;  %v650_v58 = vsub.f32 %v1185_v32, %v1343_v41 }
 0x15b   : > { %v952_v28 = vpop.eup %951  ;;  %v683_v46 = vmul.f32 %v1237_v39, %v666_v11  ;;  %v1389_v20 = vadd.f32 1e-05, %v502_v56  ;;  %v503_v38 = vmax.f32 %v490_v31, 0.0  ;;  %v659_v31 = vsub.f32 %v1170_v26, %v1375_v1 }
 0x15c   : > { %v618_v37 = vmul.f32 %v952_v28, %v1365_v6  ;;  %v590_v12 = vmul.f32 0.5, %v589_v27  ;;  %v542_v29 = vmul.f32 %v948_v13, %v541_v34  ;;  %vm624_vm13 = vweird.f32 %v952_v28 }
 0x15d   : > { %v700_v40 = vadd.f32 %v1244_v43, %v683_v46  ;;  %955 = vrsqrt.f32 %v1389_v20  ;;  %v1395_v47 = vadd.f32 1e-05, %v503_v38  ;;  %vm625_vm15 = vmor %vm623_vm14, %vm624_vm13  ;;  %vm633_vm4 = vweird.f32 %v1389_v20 }
 0x15e   : > { %v619_v42 = vmul.f32 %v952_v28, %v618_v37  ;;  %v591_v49 = vsub.f32 1.5, %v590_v12  ;;  %v954_v35 = vpop.eup %953  ;;  %v546_v51 = vsel %vm545_vm9, %v948_v13, %v542_v29 }
 0x15f   : > { %713 = vst [vmem:[%s1266_s5 + $0x30] sm:$0xff] %v700_v40  ;;  %957 = vrsqrt.f32 %v1395_v47  ;;  %v662_v57 = vmul.f32 %v649_v19, %v546_v51  ;;  %v548_v36 = vmul.f32 %v954_v35, %v1384_v10  ;;  %vm554_vm0 = vweird.f32 %v954_v35 }
 0x160   : > { %v620_v54 = vmul.f32 0.5, %v619_v42  ;;  %v592_v25 = vmul.f32 %v950_v5, %v591_v49  ;;  %vm555_vm2 = vmor %vm553_vm1, %vm554_vm0  ;;  %v658_v10 = vsub.f32 %v1158_v21, %v1352_v45  ;;  %vm643_vm7 = vweird.f32 %v1395_v47 }
 0x161   : > { %v679_v16 = vmul.f32 %v1237_v39, %v662_v57  ;;  %v549_v52 = vmul.f32 %v954_v35, %v548_v36 }
 0x162   : > { %v621_v22 = vsub.f32 1.5, %v620_v54  ;;  %v596_v3 = vsel %vm595_vm12, %v950_v5, %v592_v25 }
 0x163   : > { %v956_v44 = vpop.eup %955  ;;  %v667_v61 = vmul.f32 %v654_v59, %v596_v3  ;;  %v696_v18 = vadd.f32 %v1244_v43, %v679_v16  ;;  %v550_v33 = vmul.f32 0.5, %v549_v52 }
 0x164   : > { %v622_v60 = vmul.f32 %v952_v28, %v621_v22  ;;  %v628_v50 = vmul.f32 %v956_v44, %v1389_v20  ;;  %vm634_vm3 = vweird.f32 %v956_v44 }
 0x165   : > { %v958_v53 = vpop.eup %957  ;;  %v684_v13 = vmul.f32 %v1237_v39, %v667_v61  ;;  %709 = vst [vmem:[%s1266_s5 + $0x10] sm:$0xff] %v696_v18  ;;  %v551_v55 = vsub.f32 1.5, %v550_v33  ;;  %vm635_vm5 = vmor %vm633_vm4, %vm634_vm3 }
 0x166   : > { %v626_v63 = vsel %vm625_vm15, %v952_v28, %v622_v60  ;;  %v629_v0 = vmul.f32 %v956_v44, %v628_v50  ;;  %v638_v6 = vmul.f32 %v958_v53, %v1395_v47  ;;  %vm644_vm6 = vweird.f32 %v958_v53 }
 0x167   : > { %v670_v14 = vmul.f32 %v657_v62, %v626_v63  ;;  %v701_v23 = vadd.f32 %v1244_v43, %v684_v13  ;;  %v552_v48 = vmul.f32 %v954_v35, %v551_v55  ;;  %vm645_vm8 = vmor %vm643_vm7, %vm644_vm6 }
 0x168   : > { %v630_v30 = vmul.f32 0.5, %v629_v0  ;;  %v639_v2 = vmul.f32 %v958_v53, %v638_v6 }
 0x169   : > { %v687_v17 = vmul.f32 %v1237_v39, %v670_v14  ;;  %714 = vst [vmem:[%s1266_s5 + $0x38] sm:$0xff] %v701_v23  ;;  %v556_v7 = vsel %vm555_vm2, %v954_v35, %v552_v48 }
 0x16a   : > { %v631_v4 = vsub.f32 1.5, %v630_v30  ;;  %v640_v8 = vmul.f32 0.5, %v639_v2  ;;  %v663_v9 = vmul.f32 %v650_v58, %v556_v7 }
 0x16b   : > { %v704_v5 = vadd.f32 %v1244_v43, %v687_v17 }
 0x16c   : > { %v632_v11 = vmul.f32 %v956_v44, %v631_v4  ;;  %v641_v24 = vsub.f32 1.5, %v640_v8  ;;  %v680_v32 = vmul.f32 %v1237_v39, %v663_v9 }
 0x16d   : > { %717 = vst [vmem:[%s1266_s5 + $0x50] sm:$0xff] %v704_v5 }
 0x16e   : > { %v636_v41 = vsel %vm635_vm5, %v956_v44, %v632_v11  ;;  %v642_v15 = vmul.f32 %v958_v53, %v641_v24  ;;  %v697_v28 = vadd.f32 %v1244_v43, %v680_v32 }
 0x16f   : > { %v671_v56 = vmul.f32 %v658_v10, %v636_v41 }
 0x170   : > { %v646_v45 = vsel %vm645_vm8, %v958_v53, %v642_v15  ;;  %710 = vst [vmem:[%s1266_s5 + $0x18] sm:$0xff] %v697_v28 }
 0x171   : > { %v688_v21 = vmul.f32 %v1237_v39, %v671_v56  ;;  %v672_v46 = vmul.f32 %v659_v31, %v646_v45 }
 0x173   : > { %v705_v27 = vadd.f32 %v1244_v43, %v688_v21  ;;  %v689_v20 = vmul.f32 %v1237_v39, %v672_v46  ;;  %727 = sbr.rel (!%p1101_p5) target bundleno = 407 (0x197), region = 40 }
 0x175   : > { %718 = vst [vmem:[%s1266_s5 + $0x58] sm:$0xff] %v705_v27  ;;  %v706_v34 = vadd.f32 %v1244_v43, %v689_v20 }
 0x177   : > { %719 = vst [vmem:[%s1266_s5 + $0x60] sm:$0xff] %v706_v34 }
 0x178   : > { %s1513_s7 = smov (!%p730_p11, %s729_s7), 13 }
 0x179   : > { %s857_s8 = sshll.u32 %s1513_s7, 3 }
 0x17a   : > { %s733_s9 = ssub.s32 104, %s857_s8 }
 0x17b   : > { %s734_s10 = sshll.u32 %s733_s9, 4 }
 0x17c   : > { %735 = vsyncadd %s1439_s6, %s734_s10  ;;  %p1448_p12 = scmp.ne.s32.totalorder %s857_s8, 0  ;;  %s874_s25 = smul.u32 104, %s1084_s19 }
 0x17d   : > { %s740_s12 = sshll.u32 %s1266_s5, 4  ;;  %s861_s29 = sshll.u32 %s1513_s7, 7  ;;  %s1458_s12 = int_to_ptr.vmem [resolvable:$true] %s740_s12 }
 0x17e   : > { %s738_s20 = scalar_lea.hbm %s1504_s4, %s874_s25  ;;  %s959_s23 = sshra.s32 %s1458_s12, 4  ;;  %s960_s23 = int_to_ptr.vmem [resolvable:$true] %s959_s23 }
 0x17f   : > { %s742_s22 = sshll.u32 %s738_s20, 4  ;;  %s961_s27 = sshrl.u32 %s861_s29, 4  ;;  %s1460_s22 = int_to_ptr.hbm [resolvable:$true] %s742_s22 }
 0x180   : > { %s966_s28 = scalar_lea.vmem %s960_s23, %s961_s27  ;;  %s1035_s19 = smov [#allocation2]  }
 0x181   : > { %p967_p13 = scmp.ne.s32.totalorder %s960_s23, %s966_s28  ;;  %s970_s30 = scalar_lea.vmem %s1035_s19, 208 }
 0x182   : > { %p972_p2 = scmp.lt.s32.totalorder %s970_s30, %s966_s28 }
 0x183   : > { %p968_p0 = pnand %p967_p13, %p1448_p12 }
 0x185   : > { %p969_p1 = pneg %p968_p0 }
 0x187   : > { %p974_p3 = pnand %p972_p2, %p969_p1 }
 0x189   : > { %977 = shalt.err (!%p974_p3)
}
 0x18a   : > { %s978_s5 = sshra.s32 %s1460_s22, 4  ;;  %s989_s25 = scalar_lea.hbm %s1504_s4, 200  ;;  %s979_s5 = int_to_ptr.hbm [resolvable:$true] %s978_s5 }
 0x18b   : > { %s985_s8 = scalar_lea.hbm %s979_s5, %s961_s27  ;;  %p990_p8 = scmp.lt.s32.totalorder %s979_s5, %s1504_s4 }
 0x18c   : > { %p986_p4 = scmp.ne.s32.totalorder %s979_s5, %s985_s8  ;;  %p991_p9 = scmp.lt.s32.totalorder %s989_s25, %s985_s8 }
 0x18e   : > { %p987_p5 = pnand %p986_p4, %p1448_p12  ;;  %p992_p10 = por %p991_p9, %p990_p8 }
 0x190   : > { %p988_p7 = pneg %p987_p5 }
 0x192   : > { %p993_p11 = pnand %p992_p10, %p988_p7 }
 0x194   : > { %996 = shalt.err (!%p993_p11)
}
 0x195   : > { %s1036_s20 = smov 128   ;;  %s1037_s23 = smov 8  }
 0x196   : > { %748 = dma.vmem_to_hbm [thread:$0]  (%p1448_p12), %s1458_s12, %s861_s29, %s1460_s22, %s1439_s6, %s1036_s20, %s1036_s20, %s1037_s23  }
 0x197 PF: > { %p893_p13 = scmp.ge.s32.totalorder %s1032_s18, 2  ;;  %s757_s27 = sand.u32 1, %s1020_s15  }
 0x198   : > { %s758_s28 = scalar_lea.sflag [#allocation3], %s757_s27 }
 0x199   : > { %p890_p0 = pnand %p893_p13, %p1105_p6 }
 0x19b   : > { %p891_p1 = pneg %p890_p0 }
 0x19d   : > { %1015 = dma.done.wait (%p891_p1), %s758_s28, 1664  }
 0x19e   : > { %1017 = vsyncadd (%p891_p1), %s758_s28, 4294965632  ;;  %p14_p2 = scmp.ge.s32.totalorder %s1088_s21, 4   ;;  %s1508_s15 = smov %s1024_s16 }
 0x19f   : > { %s1509_s16 = smov %s1028_s17  ;;  %s1510_s17 = smov %s1099_s24 }
 0x1a0   : > { %s1511_s18 = smov %s1088_s21  ;;  %16 = sbr.rel (!%p14_p2) target bundleno = 3 (0x3), region = 71 }
 0x1a5   :  { %764 = vsyncpa [#allocation3], 1 }
 0x1a6   :  { %766 = vsyncpa [#allocation3 + $0x1], 1 }

// kernel: tpu_custom_call.1
= control target key start
LH: loop header
LB: loop body
LE: loop exit
PB: predicated region body
PF: predicated region fallthrough
CT: control target
= control target key end

     0   :  { %9 = vsyncpa [#allocation3], 0  ;;  %s1500_s0 = inlined_call_operand.vmem [shape: bf16[200,64], index: 0, kind: input, shape index: {}]   ;;  %s1501_s1 = inlined_call_operand.vmem [shape: bf16[64,128], index: 1, kind: input, shape index: {}]   ;;  %s1502_s2 = inlined_call_operand.vmem [shape: f32[1,128], index: 2, kind: input, shape index: {}]   ;;  %s1503_s3 = inlined_call_operand.vmem [shape: f32[1,128], index: 3, kind: input, shape index: {}]   ;;  %s1504_s4 = inlined_call_operand.hbm [shape: f32[200,128], index: 4, kind: output, shape index: {}]  }
   0x1   :  { %11 = vsyncpa [#allocation3 + $0x1], 0  ;;  %s1063_s15 = smov 0   ;;  %s1065_s16 = smov 0  }
   0x2   :  { %s1067_s17 = smov 0   ;;  %s1069_s18 = smov 0  }
   0x3 LB: > { %s1084_s19 = sadd.s32 4294967295, %s1032_s18   ;;  %s805_s20 = sadd.s32 4294967294, %s1032_s18   ;;  %s1032_s18 = sphi %s1069_s18, %s1511_s18   ;;  %s1028_s17 = sphi %s1067_s17, %s1510_s17   ;;  %s1024_s16 = sphi %s1065_s16, %s1509_s16   ;;  %s1020_s15 = sphi %s1063_s15, %s1508_s15  }
   0x4   : > { %s1088_s21 = sadd.s32 1, %s1032_s18   ;;  %s113_s22 = sadd.s32 1, %s1028_s17 }
   0x5   : > { %s110_s23 = ssub.s32 %s1032_s18, %s1088_s21  ;;  %p123_p0 = scmp.ne.s32.totalorder %s1028_s17, %s1024_s16 }
   0x6   : > { %p111_p1 = scmp.eq.s32.totalorder %s110_s23, 0  ;;  %p124_p2 = scmp.eq.s32.totalorder %s1084_s19, 1 }
   0x7   : > { %p129_p3 = scmp.ne.s32.totalorder %s1024_s16, %s1020_s15  ;;  %p130_p4 = scmp.eq.s32.totalorder %s805_s20, 1 }
   0x8   : > { %s1099_s24 = scalar_select %p111_p1, %s1028_s17, %s113_s22  }
   0x9   : > { %p1101_p5 = por %p124_p2, %p123_p0  ;;  %p1105_p6 = por %p130_p4, %p129_p3 }
   0xa   : > { %p808_p7 = scmp.ge.s32.totalorder %s1032_s18, 1  ;;  %p174_p8 = scmp.lt.s32.totalorder %s1032_s18, 3 }
   0xc   : > { %p175_p9 = pnand %p808_p7, %p174_p8 }
   0xd   : > { %s1115_s29 = smul.u32 (!%p175_p9), 13, %s1084_s19  ;;  %s201_s20 = sand.u32 (!%p175_p9), 1, %s1024_s16  }
   0xe   : > { %178 = sbr.rel (%p175_p9) target bundleno = 407 (0x197), region = 36 }
   0xf   : > { %p209_p10 = scmp.lt.s32.totalorder (!%p175_p9), %s1115_s29, 24  ;;  %s887_s27 = smul.u32 (!%p175_p9), 104, %s201_s20 }
  0x11   : > { %s1266_s5 = scalar_lea.vmem (!%p175_p9), [#allocation2], %s887_s27 }
  0x13   : > { %v873_v0 = vld [vmem:[%s1501_s1 + $0x18] sm:$0xff]  ;;  %v872_v1 = vld [vmem:[%s1501_s1 + $0x10] sm:$0xff]  ;;  %s210_s6 = scalar_select %p209_p10, %s1115_s29, 24  ;;  %v871_v2 = vld [vmem:[%s1501_s1 + $0x8] sm:$0xff]  ;;  %vm302_vm0 = vcmask 523264   ;;  %v1034_v40 = vmov 128.0  }
  0x14   : > { %328 = vmatpush.bf16.msra.mxu0 %v873_v0  ;;  %875 = vmatpush.bf16.msra.mxu1 %v873_v0  ;;  %v870_v3 = vld [vmem:[%s1501_s1] sm:$0xff]  ;;  %931 = vrcp.f32 %v1034_v40  ;;  %s729_s7 = ssub.s32 (%p1101_p5), 25, %s1115_s29 }
  0x15   : > { %877 = vmatpush.bf16.msra.mxu3 %v873_v0  ;;  %876 = vmatpush.bf16.msra.mxu2 %v873_v0  ;;  %s809_s9 = sshll.u32 %s210_s6, 2  ;;  %s1439_s6 = scalar_lea.sflag [#allocation3], %s201_s20 }
  0x16   : > { %s212_s14 = scalar_lea.vmem %s1500_s0, %s809_s9  ;;  %p730_p11 = scmp.lt.s32.totalorder (%p1101_p5), %s729_s7, 13 }
  0x17   : > { %v864_v4 = vld [vmem:[%s212_s14] sm:$0xff]  ;;  %v866_v5 = vld [vmem:[%s212_s14 + $0x10] sm:$0xff]  ;;  %v869_v6 = vld [vmem:[%s212_s14 + $0x28] sm:$0xff] }
  0x18   : > { %329 = vmatpush.bf16.msra.mxu0 %v872_v1  ;;  %878 = vmatpush.bf16.msra.mxu1 %v872_v1  ;;  %v868_v7 = vld [vmem:[%s212_s14 + $0x20] sm:$0xff]  ;;  %v236_v8 = vld [vmem:[%s212_s14 + $0x30] sm:$0xf]  ;;  %v865_v10 = vld [vmem:[%s212_s14 + $0x8] sm:$0xff] }
  0x19   : > { %880 = vmatpush.bf16.msra.mxu3 %v872_v1  ;;  %879 = vmatpush.bf16.msra.mxu2 %v872_v1  ;;  %v270_v9 = vunpack.c.l.b16 %v236_v8  ;;  %v867_v11 = vld [vmem:[%s212_s14 + $0x18] sm:$0xff] }
  0x1a   : > { %v932_v41 = vpop.eup %931 }
  0x1b   : > { %v277_v12 = vpack.c.b16 %v270_v9, %v270_v9  ;;  %v394_v42 = vmul.f32 128.0, %v932_v41  ;;  %vm398_vm1 = vweird.f32 %v932_v41 }
  0x1c   : > { %330 = vmatpush.bf16.msra.mxu0 %v871_v2  ;;  %881 = vmatpush.bf16.msra.mxu1 %v871_v2 }
  0x1d   : > { %883 = vmatpush.bf16.msra.mxu3 %v871_v2  ;;  %882 = vmatpush.bf16.msra.mxu2 %v871_v2  ;;  %v395_v43 = vsub.f32 1.0, %v394_v42 }
  0x1f   : > { %v396_v44 = vmul.f32 %v932_v41, %v395_v43  ;;  %v1244_v43 = vld [vmem:[%s1503_s3] ss:$0 sm:$0xff] }
  0x20   : > { %331 = vmatpush.bf16.msra.mxu0 %v870_v3  ;;  %884 = vmatpush.bf16.msra.mxu1 %v870_v3 }
  0x21   : > { %886 = vmatpush.bf16.msra.mxu3 %v870_v3  ;;  %885 = vmatpush.bf16.msra.mxu2 %v870_v3  ;;  %v397_v45 = vadd.f32 %v932_v41, %v396_v44 }
  0x23   : > { %850 = vmatmul.msk.bf16.vlgmr.msra.gmra.mxu0 %vm302_vm0, %v864_v4  ;;  %852 = vmatmul.msk.bf16.vlgmr.msra.gmra.mxu1 %vm302_vm0, %v866_v5  ;;  %v1204_v46 = vsel %vm398_vm1, %v932_v41, %v397_v45 }
  0x24   : > { %855 = vmatmul.msk.bf16.vlgmr.msra.gmra.mxu3 %vm302_vm0, %v869_v6  ;;  %854 = vmatmul.msk.bf16.vlgmr.msra.gmra.mxu2 %vm302_vm0, %v868_v7 }
  0x33   : > { %851 = vmatmul.msk.bf16.gmra.mxu0 %vm302_vm0, %v865_v10  ;;  %853 = vmatmul.msk.bf16.gmra.mxu1 %vm302_vm0, %v867_v11 }
  0x34   : > { %856 = vmatmul.msk.bf16.gmra.mxu3 %vm302_vm0, %v277_v12 }
  0xa0   : > { %v1138_v13 = vpop.f32.mrf.mxu0  ;;  %v1140_v14 = vpop.f32.mrf.mxu1 }
  0xa1   : > { %375 = vadd.xlane.f32.xlu2 %v1140_v14  ;;  %367 = vadd.xlane.f32.xlu0 %v1138_v13  ;;  %v413_v15 = vmul.f32 %v1138_v13, %v1138_v13  ;;  %v417_v16 = vmul.f32 %v1140_v14, %v1140_v14 }
  0xa3   : > { %426 = vadd.xlane.f32.xlu1 %v413_v15 }
  0xa7   : > { %v1148_v17 = vpop.f32.mrf.mxu3  ;;  %v1154_v19 = vpop.f32.mrf.mxu2 }
  0xa8   : > { %v1150_v18 = vpop.f32.mrf.mxu0  ;;  %v421_v20 = vmul.f32 %v1154_v19, %v1154_v19  ;;  %v1164_v23 = vpop.f32.mrf.mxu1  ;;  %v423_v36 = vmul.f32 %v1148_v17, %v1148_v17 }
  0xa9   : > { %434 = vadd.xlane.f32.xlu2 %v417_v16  ;;  %369 = vadd.xlane.f32.xlu0 %v1150_v18  ;;  %v418_v25 = vmul.f32 %v1164_v23, %v1164_v23  ;;  %v414_v29 = vmul.f32 %v1150_v18, %v1150_v18 }
  0xab   : > { %387 = vadd.xlane.f32.xlu1 %v1148_v17 }
  0xaf   : > { %v1158_v21 = vpop.f32.mrf.mxu3  ;;  %v1166_v24 = vpop.f32.mrf.mxu2 }
  0xb0   : > { %v1161_v22 = vpop.f32.mrf.mxu0  ;;  %v422_v27 = vmul.f32 %v1166_v24, %v1166_v24  ;;  %v1176_v28 = vpop.f32.mrf.mxu1  ;;  %v424_v38 = vmul.f32 %v1158_v21, %v1158_v21 }
  0xb1   : > { %383 = vadd.xlane.f32.xlu2 %v1154_v19  ;;  %442 = vadd.xlane.f32.xlu0 %v421_v20  ;;  %v419_v30 = vmul.f32 %v1176_v28, %v1176_v28  ;;  %v415_v35 = vmul.f32 %v1161_v22, %v1161_v22 }
  0xb3   : > { %371 = vadd.xlane.f32.xlu1 %v1161_v22 }
  0xb7   : > { %v1170_v26 = vpop.f32.mrf.mxu3 }
  0xb8   : > { %v1185_v32 = vpop.f32.mrf.mxu0  ;;  %v1188_v33 = vpop.f32.mrf.mxu1  ;;  %v425_v39 = vmul.f32 %v1170_v26, %v1170_v26 }
  0xb9   : > { %377 = vadd.xlane.f32.xlu2 %v1164_v23  ;;  %436 = vadd.xlane.f32.xlu0 %v418_v25  ;;  %v420_v34 = vmul.f32 %v1188_v33, %v1188_v33  ;;  %v416_v37 = vmul.f32 %v1185_v32, %v1185_v32 }
  0xbb   : > { %444 = vadd.xlane.f32.xlu1 %v422_v27 }
  0xbf   : > { %v365_v31 = vpop.f32.mrf.mxu3 }
  0xc1   : > { %385 = vadd.xlane.f32.xlu0 %v1166_v24  ;;  %428 = vadd.xlane.f32.xlu2 %v414_v29 }
  0xc3   : > { %438 = vadd.xlane.f32.xlu1 %v419_v30 }
  0xc9   : > { %379 = vadd.xlane.f32.xlu0 %v1176_v28  ;;  %389 = vadd.xlane.f32.xlu2 %v1158_v21 }
  0xcb   : > { %373 = vadd.xlane.f32.xlu1 %v1185_v32 }
  0xd1   : > { %440 = vadd.xlane.f32.xlu2 %v420_v34  ;;  %430 = vadd.xlane.f32.xlu0 %v415_v35 }
  0xd3   : > { %381 = vadd.xlane.f32.xlu1 %v1188_v33 }
  0xd9   : > { %446 = vadd.xlane.f32.xlu2 %v423_v36  ;;  %391 = vadd.xlane.f32.xlu0 %v1170_v26 }
  0xdb   : > { %432 = vadd.xlane.f32.xlu1 %v416_v37 }
  0xe1   : > { %448 = vadd.xlane.f32.xlu0 %v424_v38 }
  0xe3   : > { %450 = vadd.xlane.f32.xlu1 %v425_v39  ;;  %v1237_v39 = vld [vmem:[%s1502_s2] ss:$0 sm:$0xff] }
 0x114   : > { %v376_v47 = vpop.xlane.xlu2 %375  ;;  %v368_v48 = vpop.xlane.xlu0 %367 }
 0x115   : > { %v400_v49 = vmul.f32 %v1204_v46, %v368_v48  ;;  %v1209_v53 = vmul.f32 %v1204_v46, %v376_v47 }
 0x116   : > { %v427_v50 = vpop.xlane.xlu1 %426 }
 0x117   : > { %v465_v51 = vmul.f32 %v400_v49, %v400_v49  ;;  %v452_v52 = vmul.f32 %v427_v50, %v1204_v46  ;;  %v469_v55 = vmul.f32 %v1209_v53, %v1209_v53  ;;  %v647_v38 = vsub.f32 %v1138_v13, %v400_v49 }
 0x119   : > { %v478_v54 = vsub.f32 %v452_v52, %v465_v51 }
 0x11b   : > { %v491_v56 = vmax.f32 %v478_v54, 0.0  ;;  %v651_v54 = vsub.f32 %v1140_v14, %v1209_v53 }
 0x11c   : > { %v435_v57 = vpop.xlane.xlu2 %434  ;;  %v370_v58 = vpop.xlane.xlu0 %369 }
 0x11d   : > { %v456_v59 = vmul.f32 %v435_v57, %v1204_v46  ;;  %v504_v60 = vadd.f32 1e-05, %v491_v56  ;;  %v1247_v13 = vmul.f32 %v1204_v46, %v370_v58 }
 0x11e   : > { %v1214_v61 = vpop.xlane.xlu1 %387 }
 0x11f   : > { %v482_v62 = vsub.f32 %v456_v59, %v469_v55  ;;  %933 = vrsqrt.f32 %v504_v60  ;;  %vm523_vm3 = vweird.f32 %v504_v60 }
 0x121   : > { %v495_v63 = vmax.f32 %v482_v62, 0.0 }
 0x123   : > { %v508_v0 = vadd.f32 1e-05, %v495_v63 }
 0x124   : > { %v384_v1 = vpop.xlane.xlu2 %383  ;;  %v443_v2 = vpop.xlane.xlu0 %442 }
 0x125   : > { %935 = vrsqrt.f32 %v508_v0  ;;  %v1217_v3 = vmul.f32 %v1204_v46, %v384_v1  ;;  %v460_v4 = vmul.f32 %v443_v2, %v1204_v46  ;;  %v934_v5 = vpop.eup %933  ;;  %vm563_vm6 = vweird.f32 %v508_v0 }
 0x126   : > { %v1220_v6 = vpop.xlane.xlu1 %371  ;;  %v518_v7 = vmul.f32 %v934_v5, %v504_v60  ;;  %vm524_vm2 = vweird.f32 %v934_v5  ;;  %v466_v60 = vmul.f32 %v1247_v13, %v1247_v13 }
 0x127   : > { %v473_v8 = vmul.f32 %v1217_v3, %v1217_v3  ;;  %vm525_vm4 = vmor %vm523_vm3, %vm524_vm2 }
 0x128   : > { %v519_v9 = vmul.f32 %v934_v5, %v518_v7 }
 0x129   : > { %v486_v10 = vsub.f32 %v460_v4, %v473_v8 }
 0x12a   : > { %v520_v12 = vmul.f32 0.5, %v519_v9 }
 0x12b   : > { %v936_v11 = vpop.eup %935  ;;  %v499_v15 = vmax.f32 %v486_v10, 0.0 }
 0x12c   : > { %v558_v16 = vmul.f32 %v936_v11, %v508_v0  ;;  %v378_v20 = vpop.xlane.xlu2 %377  ;;  %v437_v25 = vpop.xlane.xlu0 %436  ;;  %v521_v27 = vsub.f32 1.5, %v520_v12  ;;  %vm564_vm5 = vweird.f32 %v936_v11 }
 0x12d   : > { %v1224_v29 = vadd.f32 1e-05, %v499_v15  ;;  %v1227_v30 = vmul.f32 %v1204_v46, %v378_v20  ;;  %v457_v37 = vmul.f32 %v437_v25, %v1204_v46  ;;  %vm565_vm7 = vmor %vm563_vm6, %vm564_vm5 }
 0x12e   : > { %v559_v31 = vmul.f32 %v936_v11, %v558_v16  ;;  %v445_v34 = vpop.xlane.xlu1 %444  ;;  %v522_v35 = vmul.f32 %v934_v5, %v521_v27 }
 0x12f   : > { %937 = vrsqrt.f32 %v1224_v29  ;;  %v470_v36 = vmul.f32 %v1227_v30, %v1227_v30  ;;  %v461_v14 = vmul.f32 %v445_v34, %v1204_v46  ;;  %vm603_vm9 = vweird.f32 %v1224_v29 }
 0x130   : > { %v560_v40 = vmul.f32 0.5, %v559_v31  ;;  %v526_v41 = vsel %vm525_vm4, %v934_v5, %v522_v35 }
 0x131   : > { %v483_v42 = vsub.f32 %v457_v37, %v470_v36  ;;  %v660_v44 = vmul.f32 %v647_v38, %v526_v41  ;;  %v655_v36 = vsub.f32 %v1154_v19, %v1217_v3 }
 0x132   : > { %v561_v45 = vsub.f32 1.5, %v560_v40 }
 0x133   : > { %v496_v47 = vmax.f32 %v483_v42, 0.0  ;;  %v677_v48 = vmul.f32 %v1237_v39, %v660_v44  ;;  %v1294_v44 = vmul.f32 %v1204_v46, %v1220_v6  ;;  %v648_v6 = vsub.f32 %v1150_v18, %v1247_v13 }
 0x134   : > { %v562_v49 = vmul.f32 %v936_v11, %v561_v45  ;;  %v386_v50 = vpop.xlane.xlu0 %385  ;;  %v429_v51 = vpop.xlane.xlu2 %428  ;;  %v652_v18 = vsub.f32 %v1164_v23, %v1227_v30 }
 0x135   : > { %v938_v52 = vpop.eup %937  ;;  %v1252_v55 = vadd.f32 1e-05, %v496_v47  ;;  %v1255_v56 = vmul.f32 %v1204_v46, %v386_v50  ;;  %v453_v57 = vmul.f32 %v429_v51, %v1204_v46  ;;  %v694_v58 = vadd.f32 %v1244_v43, %v677_v48 }
 0x136   : > { %v566_v59 = vsel %vm565_vm7, %v936_v11, %v562_v49  ;;  %v598_v62 = vmul.f32 %v938_v52, %v1224_v29  ;;  %v439_v63 = vpop.xlane.xlu1 %438  ;;  %vm604_vm8 = vweird.f32 %v938_v52  ;;  %v1301_v48 = vmul.f32 %v1204_v46, %v1214_v61 }
 0x137   : > { %v664_v0 = vmul.f32 %v651_v54, %v566_v59  ;;  %939 = vrsqrt.f32 %v1252_v55  ;;  %v474_v53 = vmul.f32 %v1255_v56, %v1255_v56  ;;  %707 = vst [vmem:[%s1266_s5] sm:$0xff] %v694_v58  ;;  %v479_v2 = vsub.f32 %v453_v57, %v466_v60  ;;  %vm605_vm10 = vmor %vm603_vm9, %vm604_vm8 }
 0x138   : > { %v599_v1 = vmul.f32 %v938_v52, %v598_v62  ;;  %v458_v37 = vmul.f32 %v439_v63, %v1204_v46  ;;  %v467_v59 = vmul.f32 %v1294_v44, %v1294_v44  ;;  %vm573_vm12 = vweird.f32 %v1252_v55 }
 0x139   : > { %v681_v4 = vmul.f32 %v1237_v39, %v664_v0  ;;  %v487_v5 = vsub.f32 %v461_v14, %v474_v53  ;;  %v492_v8 = vmax.f32 %v479_v2, 0.0  ;;  %v475_v0 = vmul.f32 %v1301_v48, %v1301_v48 }
 0x13a   : > { %v600_v7 = vmul.f32 0.5, %v599_v1  ;;  %v656_v23 = vsub.f32 %v1166_v24, %v1255_v56 }
 0x13b   : > { %v698_v9 = vadd.f32 %v1244_v43, %v681_v4  ;;  %v500_v10 = vmax.f32 %v487_v5, 0.0  ;;  %v1271_v12 = vadd.f32 1e-05, %v492_v8 }
 0x13c   : > { %v601_v11 = vsub.f32 1.5, %v600_v7  ;;  %v380_v15 = vpop.xlane.xlu0 %379  ;;  %v1273_v16 = vpop.xlane.xlu2 %389 }
 0x13d   : > { %v940_v20 = vpop.eup %939  ;;  %711 = vst [vmem:[%s1266_s5 + $0x20] sm:$0xff] %v698_v9  ;;  %v1276_v25 = vadd.f32 1e-05, %v500_v10  ;;  %v1279_v27 = vmul.f32 %v1204_v46, %v380_v15  ;;  %941 = vrsqrt.f32 %v1271_v12  ;;  %vm533_vm1 = vweird.f32 %v1271_v12 }
 0x13e   : > { %v602_v31 = vmul.f32 %v938_v52, %v601_v11  ;;  %v568_v34 = vmul.f32 %v940_v20, %v1252_v55  ;;  %v1284_v35 = vpop.xlane.xlu1 %373  ;;  %vm574_vm11 = vweird.f32 %v940_v20 }
 0x13f   : > { %943 = vrsqrt.f32 %v1276_v25  ;;  %v471_v38 = vmul.f32 %v1279_v27, %v1279_v27  ;;  %vm575_vm13 = vmor %vm573_vm12, %vm574_vm11  ;;  %vm613_vm14 = vweird.f32 %v1276_v25 }
 0x140   : > { %v606_v40 = vsel %vm605_vm10, %v938_v52, %v602_v31  ;;  %v569_v41 = vmul.f32 %v940_v20, %v568_v34 }
 0x141   : > { %v668_v29 = vmul.f32 %v655_v36, %v606_v40  ;;  %v484_v42 = vsub.f32 %v458_v37, %v471_v38 }
 0x142   : > { %v570_v45 = vmul.f32 0.5, %v569_v41  ;;  %v1343_v41 = vmul.f32 %v1204_v46, %v1284_v35 }
 0x143   : > { %v685_v47 = vmul.f32 %v1237_v39, %v668_v29  ;;  %v497_v19 = vmax.f32 %v484_v42, 0.0  ;;  %v1297_v3 = vpop.eup %941 }
 0x144   : > { %v571_v49 = vsub.f32 1.5, %v570_v45  ;;  %v441_v50 = vpop.xlane.xlu2 %440  ;;  %v431_v51 = vpop.xlane.xlu0 %430  ;;  %v528_v57 = vmul.f32 %v1297_v3, %v1271_v12  ;;  %vm534_vm15 = vweird.f32 %v1297_v3  ;;  %v1352_v45 = vmul.f32 %v1204_v46, %v1273_v16 }
 0x145   : > { %v944_v52 = vpop.eup %943  ;;  %v702_v54 = vadd.f32 %v1244_v43, %v685_v47  ;;  %v1308_v58 = vadd.f32 1e-05, %v497_v19  ;;  %v454_v63 = vmul.f32 %v431_v51, %v1204_v46  ;;  %v459_v5 = vmul.f32 %v441_v50, %v1204_v46  ;;  %vm535_vm2 = vmor %vm533_vm1, %vm534_vm15 }
 0x146   : > { %v572_v61 = vmul.f32 %v940_v20, %v571_v49  ;;  %v608_v60 = vmul.f32 %v944_v52, %v1276_v25  ;;  %v382_v62 = vpop.xlane.xlu1 %381  ;;  %v529_v13 = vmul.f32 %v1297_v3, %v528_v57  ;;  %vm614_vm0 = vweird.f32 %v944_v52 }
 0x147   : > { %715 = vst [vmem:[%s1266_s5 + $0x40] sm:$0xff] %v702_v54  ;;  %945 = vrsqrt.f32 %v1308_v58  ;;  %v1324_v53 = vmul.f32 %v1204_v46, %v382_v62  ;;  %v480_v2 = vsub.f32 %v454_v63, %v467_v59  ;;  %vm615_vm3 = vmor %vm613_vm14, %vm614_vm0  ;;  %v468_v16 = vmul.f32 %v1343_v41, %v1343_v41 }
 0x148   : > { %v576_v14 = vsel %vm575_vm13, %v940_v20, %v572_v61  ;;  %v609_v55 = vmul.f32 %v944_v52, %v608_v60  ;;  %v530_v30 = vmul.f32 0.5, %v529_v13  ;;  %vm583_vm5 = vweird.f32 %v1308_v58 }
 0x149   : > { %v665_v1 = vmul.f32 %v652_v18, %v576_v14  ;;  %v472_v7 = vmul.f32 %v1324_v53, %v1324_v53  ;;  %v493_v10 = vmax.f32 %v480_v2, 0.0  ;;  %v653_v2 = vsub.f32 %v1176_v28, %v1279_v27 }
 0x14a   : > { %v610_v4 = vmul.f32 0.5, %v609_v55  ;;  %v531_v9 = vsub.f32 1.5, %v530_v30 }
 0x14b   : > { %v682_v8 = vmul.f32 %v1237_v39, %v665_v1  ;;  %v485_v24 = vsub.f32 %v459_v5, %v472_v7  ;;  %v1337_v36 = vadd.f32 1e-05, %v493_v10 }
 0x14c   : > { %v611_v11 = vsub.f32 1.5, %v610_v4  ;;  %v447_v56 = vpop.xlane.xlu2 %446  ;;  %v392_v15 = vpop.xlane.xlu0 %391  ;;  %v532_v34 = vmul.f32 %v1297_v3, %v531_v9 }
 0x14d   : > { %v946_v20 = vpop.eup %945  ;;  %v699_v31 = vadd.f32 %v1244_v43, %v682_v8  ;;  %v462_v37 = vmul.f32 %v447_v56, %v1204_v46  ;;  %v498_v12 = vmax.f32 %v485_v24, 0.0  ;;  %947 = vrsqrt.f32 %v1337_v36 }
 0x14e   : > { %v612_v38 = vmul.f32 %v944_v52, %v611_v11  ;;  %v578_v40 = vmul.f32 %v946_v20, %v1308_v58  ;;  %v433_v29 = vpop.xlane.xlu1 %432  ;;  %v536_v42 = vsel %vm535_vm2, %v1297_v3, %v532_v34  ;;  %vm584_vm4 = vweird.f32 %v946_v20 }
 0x14f   : > { %712 = vst [vmem:[%s1266_s5 + $0x28] sm:$0xff] %v699_v31  ;;  %v488_v47 = vsub.f32 %v462_v37, %v475_v0  ;;  %v661_v49 = vmul.f32 %v648_v6, %v536_v42  ;;  %v1355_v50 = vadd.f32 1e-05, %v498_v12  ;;  %v455_v57 = vmul.f32 %v433_v29, %v1204_v46  ;;  %vm585_vm6 = vmor %vm583_vm5, %vm584_vm4 }
 0x150   : > { %v616_v19 = vsel %vm615_vm3, %v944_v52, %v612_v38  ;;  %v579_v35 = vmul.f32 %v946_v20, %v578_v40  ;;  %v476_v52 = vmul.f32 %v1352_v45, %v1352_v45  ;;  %v1375_v1 = vmul.f32 %v1204_v46, %v392_v15 }
 0x151   : > { %v669_v51 = vmul.f32 %v656_v23, %v616_v19  ;;  %v501_v54 = vmax.f32 %v488_v47, 0.0  ;;  %v678_v25 = vmul.f32 %v1237_v39, %v661_v49  ;;  %949 = vrsqrt.f32 %v1355_v50 }
 0x152   : > { %v580_v59 = vmul.f32 0.5, %v579_v35  ;;  %v481_v62 = vsub.f32 %v455_v57, %v468_v16  ;;  %v477_v9 = vmul.f32 %v1375_v1, %v1375_v1  ;;  %vm543_vm8 = vweird.f32 %v1337_v36 }
 0x153   : > { %v686_v3 = vmul.f32 %v1237_v39, %v669_v51  ;;  %v1365_v6 = vadd.f32 1e-05, %v501_v54  ;;  %v695_v61 = vadd.f32 %v1244_v43, %v678_v25  ;;  %v948_v13 = vpop.eup %947  ;;  %v649_v19 = vsub.f32 %v1161_v22, %v1294_v44 }
 0x154   : > { %v581_v60 = vsub.f32 1.5, %v580_v59  ;;  %v449_v18 = vpop.xlane.xlu0 %448  ;;  %v538_v55 = vmul.f32 %v948_v13, %v1337_v36  ;;  %v494_v23 = vmax.f32 %v481_v62, 0.0  ;;  %vm544_vm7 = vweird.f32 %v948_v13 }
 0x155   : > { %v703_v63 = vadd.f32 %v1244_v43, %v686_v3  ;;  %951 = vrsqrt.f32 %v1365_v6  ;;  %v463_v0 = vmul.f32 %v449_v18, %v1204_v46  ;;  %708 = vst [vmem:[%s1266_s5 + $0x8] sm:$0xff] %v695_v61  ;;  %vm545_vm9 = vmor %vm543_vm8, %vm544_vm7  ;;  %vm593_vm11 = vweird.f32 %v1355_v50 }
 0x156   : > { %v582_v14 = vmul.f32 %v946_v20, %v581_v60  ;;  %v451_v30 = vpop.xlane.xlu1 %450  ;;  %v539_v8 = vmul.f32 %v948_v13, %v538_v55  ;;  %v1384_v10 = vadd.f32 1e-05, %v494_v23  ;;  %v654_v59 = vsub.f32 %v1188_v33, %v1324_v53 }
 0x157   : > { %716 = vst [vmem:[%s1266_s5 + $0x48] sm:$0xff] %v703_v63  ;;  %v489_v58 = vsub.f32 %v463_v0, %v476_v52  ;;  %v464_v4 = vmul.f32 %v451_v30, %v1204_v46  ;;  %v950_v5 = vpop.eup %949  ;;  %vm623_vm14 = vweird.f32 %v1365_v6  ;;  %v657_v62 = vsub.f32 %v1148_v17, %v1301_v48 }
 0x158   : > { %v586_v7 = vsel %vm585_vm6, %v946_v20, %v582_v14  ;;  %v588_v24 = vmul.f32 %v950_v5, %v1355_v50  ;;  %v540_v15 = vmul.f32 0.5, %v539_v8  ;;  %953 = vrsqrt.f32 %v1384_v10 }
 0x159   : > { %v666_v11 = vmul.f32 %v653_v2, %v586_v7  ;;  %v502_v56 = vmax.f32 %v489_v58, 0.0  ;;  %v490_v31 = vsub.f32 %v464_v4, %v477_v9  ;;  %vm594_vm10 = vweird.f32 %v950_v5 }
 0x15a   : > { %v589_v27 = vmul.f32 %v950_v5, %v588_v24  ;;  %v541_v34 = vsub.f32 1.5, %v540_v15  ;;  %vm595_vm12 = vmor %vm593_vm11, %vm594_vm10  ;;  %vm553_vm1 = vweird.f32 %v1384_v10  ;;  %v650_v58 = vsub.f32 %v1185_v32, %v1343_v41 }
 0x15b   : > { %v952_v28 = vpop.eup %951  ;;  %v683_v46 = vmul.f32 %v1237_v39, %v666_v11  ;;  %v1389_v20 = vadd.f32 1e-05, %v502_v56  ;;  %v503_v38 = vmax.f32 %v490_v31, 0.0  ;;  %v659_v31 = vsub.f32 %v1170_v26, %v1375_v1 }
 0x15c   : > { %v618_v37 = vmul.f32 %v952_v28, %v1365_v6  ;;  %v590_v12 = vmul.f32 0.5, %v589_v27  ;;  %v542_v29 = vmul.f32 %v948_v13, %v541_v34  ;;  %vm624_vm13 = vweird.f32 %v952_v28 }
 0x15d   : > { %v700_v40 = vadd.f32 %v1244_v43, %v683_v46  ;;  %955 = vrsqrt.f32 %v1389_v20  ;;  %v1395_v47 = vadd.f32 1e-05, %v503_v38  ;;  %vm625_vm15 = vmor %vm623_vm14, %vm624_vm13  ;;  %vm633_vm4 = vweird.f32 %v1389_v20 }
 0x15e   : > { %v619_v42 = vmul.f32 %v952_v28, %v618_v37  ;;  %v591_v49 = vsub.f32 1.5, %v590_v12  ;;  %v954_v35 = vpop.eup %953  ;;  %v546_v51 = vsel %vm545_vm9, %v948_v13, %v542_v29 }
 0x15f   : > { %713 = vst [vmem:[%s1266_s5 + $0x30] sm:$0xff] %v700_v40  ;;  %957 = vrsqrt.f32 %v1395_v47  ;;  %v662_v57 = vmul.f32 %v649_v19, %v546_v51  ;;  %v548_v36 = vmul.f32 %v954_v35, %v1384_v10  ;;  %vm554_vm0 = vweird.f32 %v954_v35 }
 0x160   : > { %v620_v54 = vmul.f32 0.5, %v619_v42  ;;  %v592_v25 = vmul.f32 %v950_v5, %v591_v49  ;;  %vm555_vm2 = vmor %vm553_vm1, %vm554_vm0  ;;  %v658_v10 = vsub.f32 %v1158_v21, %v1352_v45  ;;  %vm643_vm7 = vweird.f32 %v1395_v47 }
 0x161   : > { %v679_v16 = vmul.f32 %v1237_v39, %v662_v57  ;;  %v549_v52 = vmul.f32 %v954_v35, %v548_v36 }
 0x162   : > { %v621_v22 = vsub.f32 1.5, %v620_v54  ;;  %v596_v3 = vsel %vm595_vm12, %v950_v5, %v592_v25 }
 0x163   : > { %v956_v44 = vpop.eup %955  ;;  %v667_v61 = vmul.f32 %v654_v59, %v596_v3  ;;  %v696_v18 = vadd.f32 %v1244_v43, %v679_v16  ;;  %v550_v33 = vmul.f32 0.5, %v549_v52 }
 0x164   : > { %v622_v60 = vmul.f32 %v952_v28, %v621_v22  ;;  %v628_v50 = vmul.f32 %v956_v44, %v1389_v20  ;;  %vm634_vm3 = vweird.f32 %v956_v44 }
 0x165   : > { %v958_v53 = vpop.eup %957  ;;  %v684_v13 = vmul.f32 %v1237_v39, %v667_v61  ;;  %709 = vst [vmem:[%s1266_s5 + $0x10] sm:$0xff] %v696_v18  ;;  %v551_v55 = vsub.f32 1.5, %v550_v33  ;;  %vm635_vm5 = vmor %vm633_vm4, %vm634_vm3 }
 0x166   : > { %v626_v63 = vsel %vm625_vm15, %v952_v28, %v622_v60  ;;  %v629_v0 = vmul.f32 %v956_v44, %v628_v50  ;;  %v638_v6 = vmul.f32 %v958_v53, %v1395_v47  ;;  %vm644_vm6 = vweird.f32 %v958_v53 }
 0x167   : > { %v670_v14 = vmul.f32 %v657_v62, %v626_v63  ;;  %v701_v23 = vadd.f32 %v1244_v43, %v684_v13  ;;  %v552_v48 = vmul.f32 %v954_v35, %v551_v55  ;;  %vm645_vm8 = vmor %vm643_vm7, %vm644_vm6 }
 0x168   : > { %v630_v30 = vmul.f32 0.5, %v629_v0  ;;  %v639_v2 = vmul.f32 %v958_v53, %v638_v6 }
 0x169   : > { %v687_v17 = vmul.f32 %v1237_v39, %v670_v14  ;;  %714 = vst [vmem:[%s1266_s5 + $0x38] sm:$0xff] %v701_v23  ;;  %v556_v7 = vsel %vm555_vm2, %v954_v35, %v552_v48 }
 0x16a   : > { %v631_v4 = vsub.f32 1.5, %v630_v30  ;;  %v640_v8 = vmul.f32 0.5, %v639_v2  ;;  %v663_v9 = vmul.f32 %v650_v58, %v556_v7 }
 0x16b   : > { %v704_v5 = vadd.f32 %v1244_v43, %v687_v17 }
 0x16c   : > { %v632_v11 = vmul.f32 %v956_v44, %v631_v4  ;;  %v641_v24 = vsub.f32 1.5, %v640_v8  ;;  %v680_v32 = vmul.f32 %v1237_v39, %v663_v9 }
 0x16d   : > { %717 = vst [vmem:[%s1266_s5 + $0x50] sm:$0xff] %v704_v5 }
 0x16e   : > { %v636_v41 = vsel %vm635_vm5, %v956_v44, %v632_v11  ;;  %v642_v15 = vmul.f32 %v958_v53, %v641_v24  ;;  %v697_v28 = vadd.f32 %v1244_v43, %v680_v32 }
 0x16f   : > { %v671_v56 = vmul.f32 %v658_v10, %v636_v41 }
 0x170   : > { %v646_v45 = vsel %vm645_vm8, %v958_v53, %v642_v15  ;;  %710 = vst [vmem:[%s1266_s5 + $0x18] sm:$0xff] %v697_v28 }
 0x171   : > { %v688_v21 = vmul.f32 %v1237_v39, %v671_v56  ;;  %v672_v46 = vmul.f32 %v659_v31, %v646_v45 }
 0x173   : > { %v705_v27 = vadd.f32 %v1244_v43, %v688_v21  ;;  %v689_v20 = vmul.f32 %v1237_v39, %v672_v46  ;;  %727 = sbr.rel (!%p1101_p5) target bundleno = 407 (0x197), region = 40 }
 0x175   : > { %718 = vst [vmem:[%s1266_s5 + $0x58] sm:$0xff] %v705_v27  ;;  %v706_v34 = vadd.f32 %v1244_v43, %v689_v20 }
 0x177   : > { %719 = vst [vmem:[%s1266_s5 + $0x60] sm:$0xff] %v706_v34 }
 0x178   : > { %s1513_s7 = smov (!%p730_p11, %s729_s7), 13 }
 0x179   : > { %s857_s8 = sshll.u32 %s1513_s7, 3 }
 0x17a   : > { %s733_s9 = ssub.s32 104, %s857_s8 }
 0x17b   : > { %s734_s10 = sshll.u32 %s733_s9, 4 }
 0x17c   : > { %735 = vsyncadd %s1439_s6, %s734_s10  ;;  %p1448_p12 = scmp.ne.s32.totalorder %s857_s8, 0  ;;  %s874_s25 = smul.u32 104, %s1084_s19 }
 0x17d   : > { %s740_s12 = sshll.u32 %s1266_s5, 4  ;;  %s861_s29 = sshll.u32 %s1513_s7, 7  ;;  %s1458_s12 = int_to_ptr.vmem [resolvable:$true] %s740_s12 }
 0x17e   : > { %s738_s20 = scalar_lea.hbm %s1504_s4, %s874_s25  ;;  %s959_s23 = sshra.s32 %s1458_s12, 4  ;;  %s960_s23 = int_to_ptr.vmem [resolvable:$true] %s959_s23 }
 0x17f   : > { %s742_s22 = sshll.u32 %s738_s20, 4  ;;  %s961_s27 = sshrl.u32 %s861_s29, 4  ;;  %s1460_s22 = int_to_ptr.hbm [resolvable:$true] %s742_s22 }
 0x180   : > { %s966_s28 = scalar_lea.vmem %s960_s23, %s961_s27  ;;  %s1035_s19 = smov [#allocation2]  }
 0x181   : > { %p967_p13 = scmp.ne.s32.totalorder %s960_s23, %s966_s28  ;;  %s970_s30 = scalar_lea.vmem %s1035_s19, 208 }
 0x182   : > { %p972_p2 = scmp.lt.s32.totalorder %s970_s30, %s966_s28 }
 0x183   : > { %p968_p0 = pnand %p967_p13, %p1448_p12 }
 0x185   : > { %p969_p1 = pneg %p968_p0 }
 0x187   : > { %p974_p3 = pnand %p972_p2, %p969_p1 }
 0x189   : > { %977 = shalt.err (!%p974_p3)
}
 0x18a   : > { %s978_s5 = sshra.s32 %s1460_s22, 4  ;;  %s989_s25 = scalar_lea.hbm %s1504_s4, 200  ;;  %s979_s5 = int_to_ptr.hbm [resolvable:$true] %s978_s5 }
 0x18b   : > { %s985_s8 = scalar_lea.hbm %s979_s5, %s961_s27  ;;  %p990_p8 = scmp.lt.s32.totalorder %s979_s5, %s1504_s4 }
 0x18c   : > { %p986_p4 = scmp.ne.s32.totalorder %s979_s5, %s985_s8  ;;  %p991_p9 = scmp.lt.s32.totalorder %s989_s25, %s985_s8 }
 0x18e   : > { %p987_p5 = pnand %p986_p4, %p1448_p12  ;;  %p992_p10 = por %p991_p9, %p990_p8 }
 0x190   : > { %p988_p7 = pneg %p987_p5 }
 0x192   : > { %p993_p11 = pnand %p992_p10, %p988_p7 }
 0x194   : > { %996 = shalt.err (!%p993_p11)
}
 0x195   : > { %s1036_s20 = smov 128   ;;  %s1037_s23 = smov 8  }
 0x196   : > { %748 = dma.vmem_to_hbm [thread:$0]  (%p1448_p12), %s1458_s12, %s861_s29, %s1460_s22, %s1439_s6, %s1036_s20, %s1036_s20, %s1037_s23  }
 0x197 PF: > { %p893_p13 = scmp.ge.s32.totalorder %s1032_s18, 2  ;;  %s757_s27 = sand.u32 1, %s1020_s15  }
 0x198   : > { %s758_s28 = scalar_lea.sflag [#allocation3], %s757_s27 }
 0x199   : > { %p890_p0 = pnand %p893_p13, %p1105_p6 }
 0x19b   : > { %p891_p1 = pneg %p890_p0 }
 0x19d   : > { %1015 = dma.done.wait (%p891_p1), %s758_s28, 1664  }
 0x19e   : > { %1017 = vsyncadd (%p891_p1), %s758_s28, 4294965632  ;;  %p14_p2 = scmp.ge.s32.totalorder %s1088_s21, 4   ;;  %s1508_s15 = smov %s1024_s16 }
 0x19f   : > { %s1509_s16 = smov %s1028_s17  ;;  %s1510_s17 = smov %s1099_s24 }
 0x1a0   : > { %s1511_s18 = smov %s1088_s21  ;;  %16 = sbr.rel (!%p14_p2) target bundleno = 3 (0x3), region = 71 }
 0x1a5   :  { %764 = vsyncpa [#allocation3], 1 }
 0x1a6   :  { %766 = vsyncpa [#allocation3 + $0x1], 1 }

</bundles_post_ra>
